<compile_context>
chip_gen: v7x
topology: tpu7x:2x2x1
jax: 0.10.0
libtpu: 0.0.40
codegen_flags: <defaults>
</compile_context>

<pallas_src>
import functools
import math

import numpy as np
import jax
import jax.numpy as jnp
from jax.experimental import pallas as pl
from jax.experimental.pallas import tpu as pltpu

VMEM = pl.BlockSpec(memory_space=pltpu.MemorySpace.VMEM)

_WEIGHT_NAMES = ('nqk1', 'nqk2', 'nv1', 'nv2', 'eqk1', 'eqk2', 'ev1', 'ev2',
                 'node_emb', 'edge_emb')
_LN_NAMES = (('node_ln1', 'nln1'), ('node_ln2', 'nln2'),
             ('edge_ln1', 'eln1'), ('edge_ln2', 'eln2'))


# ----------------------------------------------------------------------------
# Parameter packing: 2 buffers instead of ~28 tiny padded arrays
# ----------------------------------------------------------------------------
def _pack_params(params):
    """Weights -> one [R, Cmax] slab (8-aligned row offsets); biases/LN params
    -> one [Rv, Vmax] slab (one vector per row).  Static slice metadata is
    returned for in-kernel extraction."""
    w_slices, blocks, row = {}, [], 0
    cmax = max(int(params[nm][0].shape[1]) for nm in _WEIGHT_NAMES)
    for nm in _WEIGHT_NAMES:
        w = params[nm][0]
        r, c = int(w.shape[0]), int(w.shape[1])
        rp = ((r + 7) // 8) * 8
        blocks.append(jnp.zeros((rp, cmax), jnp.float32).at[:r, :c].set(w))
        w_slices[nm] = (row, r, c)
        row += rp
    w_pack = jnp.concatenate(blocks, axis=0)

    vec_items = [(nm + '_b', params[nm][1]) for nm in _WEIGHT_NAMES]
    for long_name, short in _LN_NAMES:
        g, b = params[long_name]
        vec_items += [(short + '_g', g), (short + '_b', b)]
    vmax = max(int(v.shape[0]) for _, v in vec_items)
    rows = ((len(vec_items) + 7) // 8) * 8
    v_pack = jnp.zeros((rows, vmax), jnp.float32)
    v_slices = {}
    for i, (nm, vec) in enumerate(vec_items):
        length = int(vec.shape[0])
        v_pack = v_pack.at[i, :length].set(vec)
        v_slices[nm] = (i, length)
    return w_pack, v_pack, w_slices, v_slices


# ----------------------------------------------------------------------------
# The fused kernel
# ----------------------------------------------------------------------------
def _fused_kernel(xn_ref, xe_ref, xn_rep_ref, xe_rep_ref,
                  gadj_rep_ref, lgadj_rep_ref,
                  dst_oh_ref, srcT_ref, lgdst_oh_ref, lgsrcT_ref, conn_oh_ref,
                  w_ref, v_ref,
                  node_out_ref, edge_out_ref,
                  *, num_heads, w_slices, v_slices):
    h = num_heads
    n_nodes, fn = xn_ref.shape
    n_edges, fe = xe_ref.shape

    # ---- packed-parameter accessors (static slices, zero extra DMAs) ----
    def W(name):
        r0, r, c = w_slices[name]
        return w_ref[r0:r0 + r, 0:c]

    def V(name):
        i, length = v_slices[name]
        return v_ref[i:i + 1, 0:length]

    def linear_relu(x, name):
        y = jnp.dot(x, W(name), preferred_element_type=jnp.float32) + V(name + '_b')
        return jnp.maximum(y, 0.0)

    def layer_norm(x, name, eps=1e-5):
        mu = jnp.mean(x, axis=-1, keepdims=True)
        var = jnp.mean((x - mu) ** 2, axis=-1, keepdims=True)
        return (x - mu) * jax.lax.rsqrt(var + eps) * V(name + '_g') + V(name + '_b')

    # ---- torch .view(H, -1, F) via head-index arithmetic (no relayout) ----
    def flat_view(rep_out, f):
        # rep_out[r, :] == plain_out[r // H, :] (inputs were row-replicated), so
        # viewed_flat[r, :] = plain_out[r//H, (r%H)*f:(r%H+1)*f]
        #                   = rep_out[r, (r%H)*f:(r%H+1)*f]
        rows = rep_out.shape[0]
        rid = jax.lax.broadcasted_iota(jnp.int32, (rows, 1), 0)
        acc = jnp.zeros((rows, f), jnp.float32)
        for k in range(h):
            acc = acc + jnp.where(rid % h == k, rep_out[:, k * f:(k + 1) * f], 0.0)
        return acc

    def heads_to_lanes(flat, rows):
        # [H*rows, f] (head h = row block h) -> [rows, H*f] (head h = lane block h)
        return jnp.concatenate(
            [flat[i * rows:(i + 1) * rows, :] for i in range(h)], axis=1)

    def softmax_per_head(z, feats):
        # z: [rows, H]; softmax over the node/edge axis (sublanes), all heads at once
        z = z * (1.0 / math.sqrt(feats))
        m = jnp.max(z, axis=0, keepdims=True)
        ex = jnp.exp(z - m)
        s = jnp.sum(ex, axis=0, keepdims=True)
        return ex * pl.reciprocal(s, approx=True)

    def head_expand(a, f):
        # [rows, H] -> [rows, H*f]: head column h broadcast over its f-lane block
        return jnp.concatenate(
            [jnp.broadcast_to(a[:, i:i + 1], (a.shape[0], f)) for i in range(h)],
            axis=1)

    def head_sum(prod, f):
        out = prod[:, 0:f]
        for i in range(1, h):
            out = out + prod[:, i * f:(i + 1) * f]
        return out

    x_n = xn_ref[...]
    x_e = xe_ref[...]

    # ---- projections (row-replicated operands; all f32 MXU matmuls) ----
    nqk = jnp.dot(gadj_rep_ref[...], x_n, preferred_element_type=jnp.float32)
    nqk = linear_relu(linear_relu(nqk, 'nqk1'), 'nqk2')              # [H*N, H]
    nval = linear_relu(linear_relu(xn_rep_ref[...], 'nv1'), 'nv2')   # [H*N, H*Fn]
    eqk = jnp.dot(lgadj_rep_ref[...], x_e, preferred_element_type=jnp.float32)
    eqk = linear_relu(linear_relu(eqk, 'eqk1'), 'eqk2')              # [H*E, H]
    ev = linear_relu(linear_relu(xe_rep_ref[...], 'ev1'), 'ev2')     # [H*E, H*Fe]

    # ---- realize the flat .view, heads concatenated along lanes ----
    vn = heads_to_lanes(flat_view(nval, fn), n_nodes)   # [N, H*Fn]; vn[i,h*Fn+f]=V[h,i,f]
    ve = heads_to_lanes(flat_view(ev, fe), n_edges)     # [E, H*Fe]
    zn = heads_to_lanes(flat_view(nqk, 1), n_nodes)     # [N, H]    logits
    ze = heads_to_lanes(flat_view(eqk, 1), n_edges)     # [E, H]

    nsa = softmax_per_head(zn, fn)                      # [N, H]  nsa[i,h]
    esa = softmax_per_head(ze, fe)                      # [E, H]  esa[e,h]

    # ---- head-batched gather / weight / scatter ----
    # node messages: msg[n, h*Fn+f] = sum_{e: src[e]=n} esa[e,h] * V[h, dst[e], f]
    gv = jnp.dot(dst_oh_ref[...], vn, preferred_element_type=jnp.float32)      # [E, H*Fn]
    msg_n = jnp.dot(srcT_ref[...], gv * head_expand(esa, fn),
                    preferred_element_type=jnp.float32)                        # [N, H*Fn]
    pooled_n = head_sum(msg_n * vn, fn)                                        # [N, Fn]

    # edge messages: msg[e, h*Fe+f] = sum_{le: lgsrc[le]=e} nsa[conn[le],h] * Ve[h, lgdst[le], f]
    gatt = jnp.dot(conn_oh_ref[...], nsa, preferred_element_type=jnp.float32)  # [LE, H]
    ge = jnp.dot(lgdst_oh_ref[...], ve, preferred_element_type=jnp.float32)    # [LE, H*Fe]
    msg_e = jnp.dot(lgsrcT_ref[...], ge * head_expand(gatt, fe),
                    preferred_element_type=jnp.float32)                        # [E, H*Fe]
    pooled_e = head_sum(msg_e * ve, fe)                                        # [E, Fe]

    # ---- long residual -> LayerNorm -> Linear+ReLU -> LayerNorm ----
    y_n = linear_relu(layer_norm(pooled_n + x_n, 'nln1'), 'node_emb')
    node_out_ref[...] = layer_norm(y_n, 'nln2')
    y_e = linear_relu(layer_norm(pooled_e + x_e, 'eln1'), 'edge_emb')
    edge_out_ref[...] = layer_norm(y_e, 'eln2')


# ----------------------------------------------------------------------------
# Full layer forward: one pallas_call
# ----------------------------------------------------------------------------
@functools.partial(jax.jit, static_argnames=('num_heads',))
def mutual_attention_transformer_layer(params, g_adj, lg_adj, node_inputs,
                                        edge_inputs, dst_oh, srcT, lgdst_oh,
                                        lgsrcT, conn_oh, *, num_heads):
    n, fn = node_inputs.shape
    e, fe = edge_inputs.shape
    le = lgdst_oh.shape[0]
    fon = params['node_emb'][0].shape[1]
    foe = params['edge_emb'][0].shape[1]
    h = num_heads

    w_pack, v_pack, w_slices, v_slices = _pack_params(params)

    # Row-replicate the projection operands so the torch flat .view becomes a
    # per-row head-column select in-kernel (tiny, fused by XLA, no relayout).
    xn_rep = jnp.repeat(node_inputs, h, axis=0)          # [H*N, Fn]
    xe_rep = jnp.repeat(edge_inputs, h, axis=0)          # [H*E, Fe]
    gadj_rep = jnp.repeat(g_adj, h, axis=0)              # [H*N, N]
    lgadj_rep = jnp.repeat(lg_adj, h, axis=0)            # [H*E, E]

    kernel = functools.partial(_fused_kernel, num_heads=h,
                               w_slices=w_slices, v_slices=v_slices)

    flops = 2 * (
        (h * n) * n * fn + (h * n) * fn * (4 * h) + (h * n) * (4 * h) * h
        + (h * n) * fn * (4 * h * fn) + (h * n) * (4 * h * fn) * (h * fn)
        + (h * e) * e * fe + (h * e) * fe * (4 * h) + (h * e) * (4 * h) * h
        + (h * e) * fe * (4 * h * fe) + (h * e) * (4 * h * fe) * (h * fe)
        + e * n * (h * fn) + n * e * (h * fn)
        + le * n * h + le * e * (h * fe) + e * le * (h * fe)
        + n * fn * fon + e * fe * foe)
    bytes_accessed = 4 * (n * fn + e * fe + h * n * fn + h * e * fe
                          + h * n * n + h * e * e + 2 * e * n + 2 * le * e
                          + le * n + int(w_pack.size) + int(v_pack.size)
                          + n * fon + e * foe)
    cost = pl.CostEstimate(flops=int(flops), transcendentals=int(h * (n + e)),
                           bytes_accessed=int(bytes_accessed))

    return pl.pallas_call(
        kernel,
        out_shape=(jax.ShapeDtypeStruct((n, fon), jnp.float32),
                   jax.ShapeDtypeStruct((e, foe), jnp.float32)),
        in_specs=[VMEM] * 13,
        out_specs=(VMEM, VMEM),
        compiler_params=pltpu.CompilerParams(vmem_limit_bytes=32 * 1024 * 1024),
        cost_estimate=cost,
    )(node_inputs, edge_inputs, xn_rep, xe_rep, gadj_rep, lgadj_rep,
      dst_oh, srcT, lgdst_oh, lgsrcT, conn_oh, w_pack, v_pack)


# ----------------------------------------------------------------------------
# Pure-JAX reference (mirrors the PyTorch math directly, explicit scatter)
# ----------------------------------------------------------------------------
def reference(params, g_adj, lg_adj, node_inputs, edge_inputs,
              src, dst, lg_src, lg_dst, conn, num_heads):
    n, fn = node_inputs.shape
    e, fe = edge_inputs.shape
    h = num_heads
    lin = lambda x, w, b: jnp.maximum(x @ w + b, 0.0)

    nqk = g_adj @ node_inputs
    nqk = lin(nqk, *params['nqk1']); nqk = lin(nqk, *params['nqk2'])
    nqk = nqk.reshape(h, n, 1)
    nval = lin(node_inputs, *params['nv1']); nval = lin(nval, *params['nv2'])
    nval = nval.reshape(h, n, fn)
    eqk = lg_adj @ edge_inputs
    eqk = lin(eqk, *params['eqk1']); eqk = lin(eqk, *params['eqk2'])
    eqk = eqk.reshape(h, e, 1)
    ev = lin(edge_inputs, *params['ev1']); ev = lin(ev, *params['ev2'])
    ev = ev.reshape(h, e, fe)

    nsa = jax.nn.softmax(nqk / math.sqrt(fn), axis=1)
    esa = jax.nn.softmax(eqk / math.sqrt(fe), axis=1)

    nap = jnp.zeros((h, n, n), jnp.float32).at[:, src, dst].set(esa[:, :, 0])
    gathered = nsa[:, conn, 0]
    eap = jnp.zeros((h, e, e), jnp.float32).at[:, lg_src, lg_dst].set(gathered)

    nmsg = jnp.einsum('hnm,hmf->hnf', nap, nval)
    emsg = jnp.einsum('hnm,hmf->hnf', eap, ev)
    nemb = (nmsg * nval).sum(0) + node_inputs
    eemb = (emsg * ev).sum(0) + edge_inputs

    def ln(x, g, b):
        mu = x.mean(-1, keepdims=True)
        var = ((x - mu) ** 2).mean(-1, keepdims=True)
        return (x - mu) / jnp.sqrt(var + 1e-5) * g + b

    nemb = ln(nemb, *params['node_ln1'])
    eemb = ln(eemb, *params['edge_ln1'])
    nemb = lin(nemb, *params['node_emb'])
    eemb = lin(eemb, *params['edge_emb'])
    nemb = ln(nemb, *params['node_ln2'])
    eemb = ln(eemb, *params['edge_ln2'])
    return nemb, eemb


# ----------------------------------------------------------------------------
# Deterministic setup
# ----------------------------------------------------------------------------
def init_linear(key, fan_in, fan_out):
    k1, k2 = jax.random.split(key)
    bound = 1.0 / math.sqrt(fan_in)
    w = jax.random.uniform(k1, (fan_in, fan_out), jnp.float32, -bound, bound)
    b = jax.random.uniform(k2, (fan_out,), jnp.float32, -bound, bound)
    return w, b


def init_layernorm(key, feats):
    k1, k2 = jax.random.split(key)
    g = 1.0 + 0.1 * jax.random.normal(k1, (feats,), jnp.float32)
    b = 0.1 * jax.random.normal(k2, (feats,), jnp.float32)
    return g, b


if __name__ == "__main__":
    NODE_IN, NODE_OUT = 4, 8
    EDGE_IN, EDGE_OUT = 4, 8
    NUM_HEADS = 2
    N = 8  # nodes

    # ---- synthetic graph (replaces dgl.DGLGraph): ring + skip edges ----
    src = np.concatenate([np.arange(N), np.arange(N)])
    dst = np.concatenate([(np.arange(N) + 1) % N, (np.arange(N) + 2) % N])
    E = len(src)  # 16 unique directed edges
    g_adj_np = np.zeros((N, N), np.float32)
    g_adj_np[src, dst] = 1.0

    # line graph: lg node i == g edge i; lg edge i->j iff dst(i) == src(j)
    lg_src, lg_dst = [], []
    for i in range(E):
        for j in range(E):
            if dst[i] == src[j]:
                lg_src.append(i)
                lg_dst.append(j)
    lg_src = np.array(lg_src, np.int32)
    lg_dst = np.array(lg_dst, np.int32)
    LE = len(lg_src)
    lg_adj_np = np.zeros((E, E), np.float32)
    lg_adj_np[lg_src, lg_dst] = 1.0
    conn = dst[lg_src]  # destination g-node of the source lg-node (g edge)

    # linear-size one-hot gather/scatter matrices
    dst_oh = np.zeros((E, N), np.float32);    dst_oh[np.arange(E), dst] = 1.0
    srcT = np.zeros((N, E), np.float32);      srcT[src, np.arange(E)] = 1.0
    lgdst_oh = np.zeros((LE, E), np.float32); lgdst_oh[np.arange(LE), lg_dst] = 1.0
    lgsrcT = np.zeros((E, LE), np.float32);   lgsrcT[lg_src, np.arange(LE)] = 1.0
    conn_oh = np.zeros((LE, N), np.float32);  conn_oh[np.arange(LE), conn] = 1.0

    # ---- deterministic parameters ----
    key = jax.random.PRNGKey(0)
    keys = jax.random.split(key, 16)
    params = {
        'nqk1': init_linear(keys[0], NODE_IN, NUM_HEADS * 4),
        'nqk2': init_linear(keys[1], NUM_HEADS * 4, NUM_HEADS),
        'nv1': init_linear(keys[2], NODE_IN, NUM_HEADS * NODE_IN * 4),
        'nv2': init_linear(keys[3], NUM_HEADS * NODE_IN * 4, NUM_HEADS * NODE_IN),
        'eqk1': init_linear(keys[4], EDGE_IN, NUM_HEADS * 4),
        'eqk2': init_linear(keys[5], NUM_HEADS * 4, NUM_HEADS),
        'ev1': init_linear(keys[6], EDGE_IN, NUM_HEADS * EDGE_IN * 4),
        'ev2': init_linear(keys[7], NUM_HEADS * EDGE_IN * 4, NUM_HEADS * EDGE_IN),
        'node_emb': init_linear(keys[8], NODE_IN, NODE_OUT),
        'edge_emb': init_linear(keys[9], EDGE_IN, EDGE_OUT),
        'node_ln1': init_layernorm(keys[10], NODE_IN),
        'node_ln2': init_layernorm(keys[11], NODE_OUT),
        'edge_ln1': init_layernorm(keys[12], EDGE_IN),
        'edge_ln2': init_layernorm(keys[13], EDGE_OUT),
    }

    node_inputs = jax.random.normal(keys[14], (N, NODE_IN), jnp.float32)
    edge_inputs = jax.random.normal(keys[15], (E, EDGE_IN), jnp.float32)

    # ---- run fused Pallas implementation (single pallas_call) ----
    node_out, edge_out = mutual_attention_transformer_layer(
        params, jnp.asarray(g_adj_np), jnp.asarray(lg_adj_np),
        node_inputs, edge_inputs,
        jnp.asarray(dst_oh), jnp.asarray(srcT), jnp.asarray(lgdst_oh),
        jnp.asarray(lgsrcT), jnp.asarray(conn_oh), num_heads=NUM_HEADS)
    jax.block_until_ready((node_out, edge_out))

    # ---- check against pure-f32 JAX reference ----
    node_ref, edge_ref = reference(
        params, jnp.asarray(g_adj_np), jnp.asarray(lg_adj_np),
        node_inputs, edge_inputs, src, dst, lg_src, lg_dst, conn, NUM_HEADS)
    # All operands are f32 now (only approx-reciprocal softmax denominator and
    # the MXU's default matmul precision differ from the reference) -> tighter
    # tolerance than the previous bf16 version, with safety headroom.
    np.testing.assert_allclose(np.asarray(node_out), np.asarray(node_ref),
                               rtol=1e-2, atol=1e-2)
    np.testing.assert_allclose(np.asarray(edge_out), np.asarray(edge_ref),
                               rtol=1e-2, atol=1e-2)

    print("KERNEL_OK")
</pallas_src>

<mosaic_0001>
module attributes {stable_mosaic.version = 11 : i64} {
  func.func @_fused_kernel(%arg0: memref<8x4xf32, #tpu.memory_space<vmem>>, %arg1: memref<16x4xf32, #tpu.memory_space<vmem>>, %arg2: memref<16x4xf32, #tpu.memory_space<vmem>>, %arg3: memref<32x4xf32, #tpu.memory_space<vmem>>, %arg4: memref<16x8xf32, #tpu.memory_space<vmem>>, %arg5: memref<32x16xf32, #tpu.memory_space<vmem>>, %arg6: memref<16x8xf32, #tpu.memory_space<vmem>>, %arg7: memref<8x16xf32, #tpu.memory_space<vmem>>, %arg8: memref<32x16xf32, #tpu.memory_space<vmem>>, %arg9: memref<16x32xf32, #tpu.memory_space<vmem>>, %arg10: memref<32x8xf32, #tpu.memory_space<vmem>>, %arg11: memref<128x32xf32, #tpu.memory_space<vmem>>, %arg12: memref<24x32xf32, #tpu.memory_space<vmem>>, %arg13: memref<8x8xf32, #tpu.memory_space<vmem>>, %arg14: memref<16x8xf32, #tpu.memory_space<vmem>>) attributes {dimension_semantics = [], scalar_prefetch = 0 : i64, scratch_operands = 0 : i64, tpu.core_type = #tpu.core_type<tc>} {
    %c0 = arith.constant 0 : index
    %c0_0 = arith.constant 0 : index
    %0 = vector.load %arg0[%c0, %c0_0] : memref<8x4xf32, #tpu.memory_space<vmem>>, vector<8x4xf32>
    %c0_1 = arith.constant 0 : index
    %c0_2 = arith.constant 0 : index
    %1 = vector.load %arg1[%c0_1, %c0_2] : memref<16x4xf32, #tpu.memory_space<vmem>>, vector<16x4xf32>
    %c0_3 = arith.constant 0 : index
    %c0_4 = arith.constant 0 : index
    %2 = vector.load %arg4[%c0_3, %c0_4] : memref<16x8xf32, #tpu.memory_space<vmem>>, vector<16x8xf32>
    %cst = arith.constant dense<0.000000e+00> : vector<16x4xf32>
    %3 = tpu.matmul %2, %0, %cst {dimension_numbers = #tpu.dot_dimension_numbers<[1], [0], [0], [1], [0, 0, 1, 1], [], []>} : vector<16x8xf32>, vector<8x4xf32>, vector<16x4xf32> -> vector<16x4xf32>
    %c0_5 = arith.constant 0 : index
    %c0_6 = arith.constant 0 : index
    %4 = vector.load %arg11[%c0_5, %c0_6] : memref<128x32xf32, #tpu.memory_space<vmem>>, vector<4x8xf32>
    %cst_7 = arith.constant dense<0.000000e+00> : vector<16x8xf32>
    %5 = tpu.matmul %3, %4, %cst_7 {dimension_numbers = #tpu.dot_dimension_numbers<[1], [0], [0], [1], [0, 0, 1, 1], [], []>} : vector<16x4xf32>, vector<4x8xf32>, vector<16x8xf32> -> vector<16x8xf32>
    %c0_8 = arith.constant 0 : index
    %c0_9 = arith.constant 0 : index
    %6 = vector.load %arg12[%c0_8, %c0_9] : memref<24x32xf32, #tpu.memory_space<vmem>>, vector<1x8xf32>
    %7 = vector.broadcast %6 : vector<1x8xf32> to vector<16x8xf32>
    %8 = arith.addf %5, %7 : vector<16x8xf32>
    %cst_10 = arith.constant 0.000000e+00 : f32
    %9 = vector.broadcast %cst_10 : f32 to vector<16x8xf32>
    %10 = arith.maximumf %8, %9 : vector<16x8xf32>
    %c8 = arith.constant 8 : index
    %c0_11 = arith.constant 0 : index
    %11 = vector.load %arg11[%c8, %c0_11] : memref<128x32xf32, #tpu.memory_space<vmem>>, vector<8x2xf32>
    %cst_12 = arith.constant dense<0.000000e+00> : vector<16x2xf32>
    %12 = tpu.matmul %10, %11, %cst_12 {dimension_numbers = #tpu.dot_dimension_numbers<[1], [0], [0], [1], [0, 0, 1, 1], [], []>} : vector<16x8xf32>, vector<8x2xf32>, vector<16x2xf32> -> vector<16x2xf32>
    %c1 = arith.constant 1 : index
    %c0_13 = arith.constant 0 : index
    %13 = vector.load %arg12[%c1, %c0_13] : memref<24x32xf32, #tpu.memory_space<vmem>>, vector<1x2xf32>
    %14 = vector.broadcast %13 : vector<1x2xf32> to vector<16x2xf32>
    %15 = arith.addf %12, %14 : vector<16x2xf32>
    %cst_14 = arith.constant 0.000000e+00 : f32
    %16 = vector.broadcast %cst_14 : f32 to vector<16x2xf32>
    %17 = arith.maximumf %15, %16 : vector<16x2xf32>
    %c0_15 = arith.constant 0 : index
    %c0_16 = arith.constant 0 : index
    %18 = vector.load %arg2[%c0_15, %c0_16] : memref<16x4xf32, #tpu.memory_space<vmem>>, vector<16x4xf32>
    %c16 = arith.constant 16 : index
    %c0_17 = arith.constant 0 : index
    %19 = vector.load %arg11[%c16, %c0_17] : memref<128x32xf32, #tpu.memory_space<vmem>>, vector<4x32xf32>
    %cst_18 = arith.constant dense<0.000000e+00> : vector<16x32xf32>
    %20 = tpu.matmul %18, %19, %cst_18 {dimension_numbers = #tpu.dot_dimension_numbers<[1], [0], [0], [1], [0, 0, 1, 1], [], []>} : vector<16x4xf32>, vector<4x32xf32>, vector<16x32xf32> -> vector<16x32xf32>
    %c2 = arith.constant 2 : index
    %c0_19 = arith.constant 0 : index
    %21 = vector.load %arg12[%c2, %c0_19] : memref<24x32xf32, #tpu.memory_space<vmem>>, vector<1x32xf32>
    %22 = vector.broadcast %21 : vector<1x32xf32> to vector<16x32xf32>
    %23 = arith.addf %20, %22 : vector<16x32xf32>
    %cst_20 = arith.constant 0.000000e+00 : f32
    %24 = vector.broadcast %cst_20 : f32 to vector<16x32xf32>
    %25 = arith.maximumf %23, %24 : vector<16x32xf32>
    %c24 = arith.constant 24 : index
    %c0_21 = arith.constant 0 : index
    %26 = vector.load %arg11[%c24, %c0_21] : memref<128x32xf32, #tpu.memory_space<vmem>>, vector<32x8xf32>
    %cst_22 = arith.constant dense<0.000000e+00> : vector<16x8xf32>
    %27 = tpu.matmul %25, %26, %cst_22 {dimension_numbers = #tpu.dot_dimension_numbers<[1], [0], [0], [1], [0, 0, 1, 1], [], []>} : vector<16x32xf32>, vector<32x8xf32>, vector<16x8xf32> -> vector<16x8xf32>
    %c3 = arith.constant 3 : index
    %c0_23 = arith.constant 0 : index
    %28 = vector.load %arg12[%c3, %c0_23] : memref<24x32xf32, #tpu.memory_space<vmem>>, vector<1x8xf32>
    %29 = vector.broadcast %28 : vector<1x8xf32> to vector<16x8xf32>
    %30 = arith.addf %27, %29 : vector<16x8xf32>
    %cst_24 = arith.constant 0.000000e+00 : f32
    %31 = vector.broadcast %cst_24 : f32 to vector<16x8xf32>
    %32 = arith.maximumf %30, %31 : vector<16x8xf32>
    %c0_25 = arith.constant 0 : index
    %c0_26 = arith.constant 0 : index
    %33 = vector.load %arg5[%c0_25, %c0_26] : memref<32x16xf32, #tpu.memory_space<vmem>>, vector<32x16xf32>
    %cst_27 = arith.constant dense<0.000000e+00> : vector<32x4xf32>
    %34 = tpu.matmul %33, %1, %cst_27 {dimension_numbers = #tpu.dot_dimension_numbers<[1], [0], [0], [1], [0, 0, 1, 1], [], []>} : vector<32x16xf32>, vector<16x4xf32>, vector<32x4xf32> -> vector<32x4xf32>
    %c56 = arith.constant 56 : index
    %c0_28 = arith.constant 0 : index
    %35 = vector.load %arg11[%c56, %c0_28] : memref<128x32xf32, #tpu.memory_space<vmem>>, vector<4x8xf32>
    %cst_29 = arith.constant dense<0.000000e+00> : vector<32x8xf32>
    %36 = tpu.matmul %34, %35, %cst_29 {dimension_numbers = #tpu.dot_dimension_numbers<[1], [0], [0], [1], [0, 0, 1, 1], [], []>} : vector<32x4xf32>, vector<4x8xf32>, vector<32x8xf32> -> vector<32x8xf32>
    %c4 = arith.constant 4 : index
    %c0_30 = arith.constant 0 : index
    %37 = vector.load %arg12[%c4, %c0_30] : memref<24x32xf32, #tpu.memory_space<vmem>>, vector<1x8xf32>
    %38 = vector.broadcast %37 : vector<1x8xf32> to vector<32x8xf32>
    %39 = arith.addf %36, %38 : vector<32x8xf32>
    %cst_31 = arith.constant 0.000000e+00 : f32
    %40 = vector.broadcast %cst_31 : f32 to vector<32x8xf32>
    %41 = arith.maximumf %39, %40 : vector<32x8xf32>
    %c64 = arith.constant 64 : index
    %c0_32 = arith.constant 0 : index
    %42 = vector.load %arg11[%c64, %c0_32] : memref<128x32xf32, #tpu.memory_space<vmem>>, vector<8x2xf32>
    %cst_33 = arith.constant dense<0.000000e+00> : vector<32x2xf32>
    %43 = tpu.matmul %41, %42, %cst_33 {dimension_numbers = #tpu.dot_dimension_numbers<[1], [0], [0], [1], [0, 0, 1, 1], [], []>} : vector<32x8xf32>, vector<8x2xf32>, vector<32x2xf32> -> vector<32x2xf32>
    %c5 = arith.constant 5 : index
    %c0_34 = arith.constant 0 : index
    %44 = vector.load %arg12[%c5, %c0_34] : memref<24x32xf32, #tpu.memory_space<vmem>>, vector<1x2xf32>
    %45 = vector.broadcast %44 : vector<1x2xf32> to vector<32x2xf32>
    %46 = arith.addf %43, %45 : vector<32x2xf32>
    %cst_35 = arith.constant 0.000000e+00 : f32
    %47 = vector.broadcast %cst_35 : f32 to vector<32x2xf32>
    %48 = arith.maximumf %46, %47 : vector<32x2xf32>
    %c0_36 = arith.constant 0 : index
    %c0_37 = arith.constant 0 : index
    %49 = vector.load %arg3[%c0_36, %c0_37] : memref<32x4xf32, #tpu.memory_space<vmem>>, vector<32x4xf32>
    %c72 = arith.constant 72 : index
    %c0_38 = arith.constant 0 : index
    %50 = vector.load %arg11[%c72, %c0_38] : memref<128x32xf32, #tpu.memory_space<vmem>>, vector<4x32xf32>
    %cst_39 = arith.constant dense<0.000000e+00> : vector<32x32xf32>
    %51 = tpu.matmul %49, %50, %cst_39 {dimension_numbers = #tpu.dot_dimension_numbers<[1], [0], [0], [1], [0, 0, 1, 1], [], []>} : vector<32x4xf32>, vector<4x32xf32>, vector<32x32xf32> -> vector<32x32xf32>
    %c6 = arith.constant 6 : index
    %c0_40 = arith.constant 0 : index
    %52 = vector.load %arg12[%c6, %c0_40] : memref<24x32xf32, #tpu.memory_space<vmem>>, vector<1x32xf32>
    %53 = vector.broadcast %52 : vector<1x32xf32> to vector<32x32xf32>
    %54 = arith.addf %51, %53 : vector<32x32xf32>
    %cst_41 = arith.constant 0.000000e+00 : f32
    %55 = vector.broadcast %cst_41 : f32 to vector<32x32xf32>
    %56 = arith.maximumf %54, %55 : vector<32x32xf32>
    %c80 = arith.constant 80 : index
    %c0_42 = arith.constant 0 : index
    %57 = vector.load %arg11[%c80, %c0_42] : memref<128x32xf32, #tpu.memory_space<vmem>>, vector<32x8xf32>
    %cst_43 = arith.constant dense<0.000000e+00> : vector<32x8xf32>
    %58 = tpu.matmul %56, %57, %cst_43 {dimension_numbers = #tpu.dot_dimension_numbers<[1], [0], [0], [1], [0, 0, 1, 1], [], []>} : vector<32x32xf32>, vector<32x8xf32>, vector<32x8xf32> -> vector<32x8xf32>
    %c7 = arith.constant 7 : index
    %c0_44 = arith.constant 0 : index
    %59 = vector.load %arg12[%c7, %c0_44] : memref<24x32xf32, #tpu.memory_space<vmem>>, vector<1x8xf32>
    %60 = vector.broadcast %59 : vector<1x8xf32> to vector<32x8xf32>
    %61 = arith.addf %58, %60 : vector<32x8xf32>
    %cst_45 = arith.constant 0.000000e+00 : f32
    %62 = vector.broadcast %cst_45 : f32 to vector<32x8xf32>
    %63 = arith.maximumf %61, %62 : vector<32x8xf32>
    %64 = tpu.iota {dimensions = array<i32: 0>} : vector<16x1xi32>
    %cst_46 = arith.constant 0.000000e+00 : f32
    %65 = vector.broadcast %cst_46 : f32 to vector<16x4xf32>
    %c2_i32 = arith.constant 2 : i32
    %c0_i32 = arith.constant 0 : i32
    %66 = arith.cmpi eq, %c2_i32, %c0_i32 : i32
    %c1_i32 = arith.constant 1 : i32
    %67 = arith.select %66, %c1_i32, %c2_i32 : i32
    %68 = vector.broadcast %67 : i32 to vector<16x1xi32>
    %69 = arith.remsi %64, %68 : vector<16x1xi32>
    %c0_i32_47 = arith.constant 0 : i32
    %70 = vector.broadcast %c0_i32_47 : i32 to vector<16x1xi32>
    %71 = arith.cmpi ne, %69, %70 : vector<16x1xi32>
    %c0_i32_48 = arith.constant 0 : i32
    %72 = vector.broadcast %c0_i32_48 : i32 to vector<16x1xi32>
    %73 = arith.cmpi slt, %69, %72 : vector<16x1xi32>
    %c0_i32_49 = arith.constant 0 : i32
    %74 = arith.cmpi slt, %67, %c0_i32_49 : i32
    %75 = vector.broadcast %74 : i1 to vector<16x1xi1>
    %76 = vector.broadcast %75 : vector<16x1xi1> to vector<16x1xi1>
    %77 = arith.xori %73, %76 : vector<16x1xi1>
    %78 = arith.andi %77, %71 : vector<16x1xi1>
    %79 = vector.broadcast %67 : i32 to vector<16x1xi32>
    %80 = arith.addi %69, %79 : vector<16x1xi32>
    %81 = arith.select %78, %80, %69 : vector<16x1xi1>, vector<16x1xi32>
    %c0_i32_50 = arith.constant 0 : i32
    %82 = vector.broadcast %c0_i32_50 : i32 to vector<16x1xi32>
    %83 = arith.cmpi eq, %81, %82 : vector<16x1xi32>
    %84 = vector.extract_strided_slice %32 {offsets = [0, 0], sizes = [16, 4], strides = [1, 1]} : vector<16x8xf32> to vector<16x4xf32>
    %cst_51 = arith.constant 0.000000e+00 : f32
    %85 = vector.shape_cast %83 : vector<16x1xi1> to vector<16x1xi1>
    %86 = vector.broadcast %85 : vector<16x1xi1> to vector<16x4xi1>
    %87 = vector.broadcast %cst_51 : f32 to vector<16x4xf32>
    %88 = arith.select %86, %84, %87 : vector<16x4xi1>, vector<16x4xf32>
    %89 = arith.addf %65, %88 : vector<16x4xf32>
    %c2_i32_52 = arith.constant 2 : i32
    %c0_i32_53 = arith.constant 0 : i32
    %90 = arith.cmpi eq, %c2_i32_52, %c0_i32_53 : i32
    %c1_i32_54 = arith.constant 1 : i32
    %91 = arith.select %90, %c1_i32_54, %c2_i32_52 : i32
    %92 = vector.broadcast %91 : i32 to vector<16x1xi32>
    %93 = arith.remsi %64, %92 : vector<16x1xi32>
    %c0_i32_55 = arith.constant 0 : i32
    %94 = vector.broadcast %c0_i32_55 : i32 to vector<16x1xi32>
    %95 = arith.cmpi ne, %93, %94 : vector<16x1xi32>
    %c0_i32_56 = arith.constant 0 : i32
    %96 = vector.broadcast %c0_i32_56 : i32 to vector<16x1xi32>
    %97 = arith.cmpi slt, %93, %96 : vector<16x1xi32>
    %c0_i32_57 = arith.constant 0 : i32
    %98 = arith.cmpi slt, %91, %c0_i32_57 : i32
    %99 = vector.broadcast %98 : i1 to vector<16x1xi1>
    %100 = vector.broadcast %99 : vector<16x1xi1> to vector<16x1xi1>
    %101 = arith.xori %97, %100 : vector<16x1xi1>
    %102 = arith.andi %101, %95 : vector<16x1xi1>
    %103 = vector.broadcast %91 : i32 to vector<16x1xi32>
    %104 = arith.addi %93, %103 : vector<16x1xi32>
    %105 = arith.select %102, %104, %93 : vector<16x1xi1>, vector<16x1xi32>
    %c1_i32_58 = arith.constant 1 : i32
    %106 = vector.broadcast %c1_i32_58 : i32 to vector<16x1xi32>
    %107 = arith.cmpi eq, %105, %106 : vector<16x1xi32>
    %108 = vector.extract_strided_slice %32 {offsets = [0, 4], sizes = [16, 4], strides = [1, 1]} : vector<16x8xf32> to vector<16x4xf32>
    %cst_59 = arith.constant 0.000000e+00 : f32
    %109 = vector.shape_cast %107 : vector<16x1xi1> to vector<16x1xi1>
    %110 = vector.broadcast %109 : vector<16x1xi1> to vector<16x4xi1>
    %111 = vector.broadcast %cst_59 : f32 to vector<16x4xf32>
    %112 = arith.select %110, %108, %111 : vector<16x4xi1>, vector<16x4xf32>
    %113 = arith.addf %89, %112 : vector<16x4xf32>
    %114 = vector.extract_strided_slice %113 {offsets = [0, 0], sizes = [8, 4], strides = [1, 1]} : vector<16x4xf32> to vector<8x4xf32>
    %115 = vector.extract_strided_slice %113 {offsets = [8, 0], sizes = [8, 4], strides = [1, 1]} : vector<16x4xf32> to vector<8x4xf32>
    %116 = tpu.concatenate %114, %115 in 1 : vector<8x4xf32>, vector<8x4xf32> -> vector<8x8xf32>
    %117 = tpu.iota {dimensions = array<i32: 0>} : vector<32x1xi32>
    %cst_60 = arith.constant 0.000000e+00 : f32
    %118 = vector.broadcast %cst_60 : f32 to vector<32x4xf32>
    %c2_i32_61 = arith.constant 2 : i32
    %c0_i32_62 = arith.constant 0 : i32
    %119 = arith.cmpi eq, %c2_i32_61, %c0_i32_62 : i32
    %c1_i32_63 = arith.constant 1 : i32
    %120 = arith.select %119, %c1_i32_63, %c2_i32_61 : i32
    %121 = vector.broadcast %120 : i32 to vector<32x1xi32>
    %122 = arith.remsi %117, %121 : vector<32x1xi32>
    %c0_i32_64 = arith.constant 0 : i32
    %123 = vector.broadcast %c0_i32_64 : i32 to vector<32x1xi32>
    %124 = arith.cmpi ne, %122, %123 : vector<32x1xi32>
    %c0_i32_65 = arith.constant 0 : i32
    %125 = vector.broadcast %c0_i32_65 : i32 to vector<32x1xi32>
    %126 = arith.cmpi slt, %122, %125 : vector<32x1xi32>
    %c0_i32_66 = arith.constant 0 : i32
    %127 = arith.cmpi slt, %120, %c0_i32_66 : i32
    %128 = vector.broadcast %127 : i1 to vector<32x1xi1>
    %129 = vector.broadcast %128 : vector<32x1xi1> to vector<32x1xi1>
    %130 = arith.xori %126, %129 : vector<32x1xi1>
    %131 = arith.andi %130, %124 : vector<32x1xi1>
    %132 = vector.broadcast %120 : i32 to vector<32x1xi32>
    %133 = arith.addi %122, %132 : vector<32x1xi32>
    %134 = arith.select %131, %133, %122 : vector<32x1xi1>, vector<32x1xi32>
    %c0_i32_67 = arith.constant 0 : i32
    %135 = vector.broadcast %c0_i32_67 : i32 to vector<32x1xi32>
    %136 = arith.cmpi eq, %134, %135 : vector<32x1xi32>
    %137 = vector.extract_strided_slice %63 {offsets = [0, 0], sizes = [32, 4], strides = [1, 1]} : vector<32x8xf32> to vector<32x4xf32>
    %cst_68 = arith.constant 0.000000e+00 : f32
    %138 = vector.shape_cast %136 : vector<32x1xi1> to vector<32x1xi1>
    %139 = vector.broadcast %138 : vector<32x1xi1> to vector<32x4xi1>
    %140 = vector.broadcast %cst_68 : f32 to vector<32x4xf32>
    %141 = arith.select %139, %137, %140 : vector<32x4xi1>, vector<32x4xf32>
    %142 = arith.addf %118, %141 : vector<32x4xf32>
    %c2_i32_69 = arith.constant 2 : i32
    %c0_i32_70 = arith.constant 0 : i32
    %143 = arith.cmpi eq, %c2_i32_69, %c0_i32_70 : i32
    %c1_i32_71 = arith.constant 1 : i32
    %144 = arith.select %143, %c1_i32_71, %c2_i32_69 : i32
    %145 = vector.broadcast %144 : i32 to vector<32x1xi32>
    %146 = arith.remsi %117, %145 : vector<32x1xi32>
    %c0_i32_72 = arith.constant 0 : i32
    %147 = vector.broadcast %c0_i32_72 : i32 to vector<32x1xi32>
    %148 = arith.cmpi ne, %146, %147 : vector<32x1xi32>
    %c0_i32_73 = arith.constant 0 : i32
    %149 = vector.broadcast %c0_i32_73 : i32 to vector<32x1xi32>
    %150 = arith.cmpi slt, %146, %149 : vector<32x1xi32>
    %c0_i32_74 = arith.constant 0 : i32
    %151 = arith.cmpi slt, %144, %c0_i32_74 : i32
    %152 = vector.broadcast %151 : i1 to vector<32x1xi1>
    %153 = vector.broadcast %152 : vector<32x1xi1> to vector<32x1xi1>
    %154 = arith.xori %150, %153 : vector<32x1xi1>
    %155 = arith.andi %154, %148 : vector<32x1xi1>
    %156 = vector.broadcast %144 : i32 to vector<32x1xi32>
    %157 = arith.addi %146, %156 : vector<32x1xi32>
    %158 = arith.select %155, %157, %146 : vector<32x1xi1>, vector<32x1xi32>
    %c1_i32_75 = arith.constant 1 : i32
    %159 = vector.broadcast %c1_i32_75 : i32 to vector<32x1xi32>
    %160 = arith.cmpi eq, %158, %159 : vector<32x1xi32>
    %161 = vector.extract_strided_slice %63 {offsets = [0, 4], sizes = [32, 4], strides = [1, 1]} : vector<32x8xf32> to vector<32x4xf32>
    %cst_76 = arith.constant 0.000000e+00 : f32
    %162 = vector.shape_cast %160 : vector<32x1xi1> to vector<32x1xi1>
    %163 = vector.broadcast %162 : vector<32x1xi1> to vector<32x4xi1>
    %164 = vector.broadcast %cst_76 : f32 to vector<32x4xf32>
    %165 = arith.select %163, %161, %164 : vector<32x4xi1>, vector<32x4xf32>
    %166 = arith.addf %142, %165 : vector<32x4xf32>
    %167 = vector.extract_strided_slice %166 {offsets = [0, 0], sizes = [16, 4], strides = [1, 1]} : vector<32x4xf32> to vector<16x4xf32>
    %168 = vector.extract_strided_slice %166 {offsets = [16, 0], sizes = [16, 4], strides = [1, 1]} : vector<32x4xf32> to vector<16x4xf32>
    %169 = tpu.concatenate %167, %168 in 1 : vector<16x4xf32>, vector<16x4xf32> -> vector<16x8xf32>
    %170 = tpu.iota {dimensions = array<i32: 0>} : vector<16x1xi32>
    %cst_77 = arith.constant 0.000000e+00 : f32
    %171 = vector.broadcast %cst_77 : f32 to vector<16x1xf32>
    %c2_i32_78 = arith.constant 2 : i32
    %c0_i32_79 = arith.constant 0 : i32
    %172 = arith.cmpi eq, %c2_i32_78, %c0_i32_79 : i32
    %c1_i32_80 = arith.constant 1 : i32
    %173 = arith.select %172, %c1_i32_80, %c2_i32_78 : i32
    %174 = vector.broadcast %173 : i32 to vector<16x1xi32>
    %175 = arith.remsi %170, %174 : vector<16x1xi32>
    %c0_i32_81 = arith.constant 0 : i32
    %176 = vector.broadcast %c0_i32_81 : i32 to vector<16x1xi32>
    %177 = arith.cmpi ne, %175, %176 : vector<16x1xi32>
    %c0_i32_82 = arith.constant 0 : i32
    %178 = vector.broadcast %c0_i32_82 : i32 to vector<16x1xi32>
    %179 = arith.cmpi slt, %175, %178 : vector<16x1xi32>
    %c0_i32_83 = arith.constant 0 : i32
    %180 = arith.cmpi slt, %173, %c0_i32_83 : i32
    %181 = vector.broadcast %180 : i1 to vector<16x1xi1>
    %182 = vector.broadcast %181 : vector<16x1xi1> to vector<16x1xi1>
    %183 = arith.xori %179, %182 : vector<16x1xi1>
    %184 = arith.andi %183, %177 : vector<16x1xi1>
    %185 = vector.broadcast %173 : i32 to vector<16x1xi32>
    %186 = arith.addi %175, %185 : vector<16x1xi32>
    %187 = arith.select %184, %186, %175 : vector<16x1xi1>, vector<16x1xi32>
    %c0_i32_84 = arith.constant 0 : i32
    %188 = vector.broadcast %c0_i32_84 : i32 to vector<16x1xi32>
    %189 = arith.cmpi eq, %187, %188 : vector<16x1xi32>
    %190 = vector.extract_strided_slice %17 {offsets = [0, 0], sizes = [16, 1], strides = [1, 1]} : vector<16x2xf32> to vector<16x1xf32>
    %cst_85 = arith.constant 0.000000e+00 : f32
    %191 = vector.broadcast %cst_85 : f32 to vector<16x1xf32>
    %192 = arith.select %189, %190, %191 : vector<16x1xi1>, vector<16x1xf32>
    %193 = arith.addf %171, %192 : vector<16x1xf32>
    %c2_i32_86 = arith.constant 2 : i32
    %c0_i32_87 = arith.constant 0 : i32
    %194 = arith.cmpi eq, %c2_i32_86, %c0_i32_87 : i32
    %c1_i32_88 = arith.constant 1 : i32
    %195 = arith.select %194, %c1_i32_88, %c2_i32_86 : i32
    %196 = vector.broadcast %195 : i32 to vector<16x1xi32>
    %197 = arith.remsi %170, %196 : vector<16x1xi32>
    %c0_i32_89 = arith.constant 0 : i32
    %198 = vector.broadcast %c0_i32_89 : i32 to vector<16x1xi32>
    %199 = arith.cmpi ne, %197, %198 : vector<16x1xi32>
    %c0_i32_90 = arith.constant 0 : i32
    %200 = vector.broadcast %c0_i32_90 : i32 to vector<16x1xi32>
    %201 = arith.cmpi slt, %197, %200 : vector<16x1xi32>
    %c0_i32_91 = arith.constant 0 : i32
    %202 = arith.cmpi slt, %195, %c0_i32_91 : i32
    %203 = vector.broadcast %202 : i1 to vector<16x1xi1>
    %204 = vector.broadcast %203 : vector<16x1xi1> to vector<16x1xi1>
    %205 = arith.xori %201, %204 : vector<16x1xi1>
    %206 = arith.andi %205, %199 : vector<16x1xi1>
    %207 = vector.broadcast %195 : i32 to vector<16x1xi32>
    %208 = arith.addi %197, %207 : vector<16x1xi32>
    %209 = arith.select %206, %208, %197 : vector<16x1xi1>, vector<16x1xi32>
    %c1_i32_92 = arith.constant 1 : i32
    %210 = vector.broadcast %c1_i32_92 : i32 to vector<16x1xi32>
    %211 = arith.cmpi eq, %209, %210 : vector<16x1xi32>
    %212 = vector.extract_strided_slice %17 {offsets = [0, 1], sizes = [16, 1], strides = [1, 1]} : vector<16x2xf32> to vector<16x1xf32>
    %cst_93 = arith.constant 0.000000e+00 : f32
    %213 = vector.broadcast %cst_93 : f32 to vector<16x1xf32>
    %214 = arith.select %211, %212, %213 : vector<16x1xi1>, vector<16x1xf32>
    %215 = arith.addf %193, %214 : vector<16x1xf32>
    %216 = vector.extract_strided_slice %215 {offsets = [0, 0], sizes = [8, 1], strides = [1, 1]} : vector<16x1xf32> to vector<8x1xf32>
    %217 = vector.extract_strided_slice %215 {offsets = [8, 0], sizes = [8, 1], strides = [1, 1]} : vector<16x1xf32> to vector<8x1xf32>
    %218 = tpu.concatenate %216, %217 in 1 : vector<8x1xf32>, vector<8x1xf32> -> vector<8x2xf32>
    %219 = tpu.iota {dimensions = array<i32: 0>} : vector<32x1xi32>
    %cst_94 = arith.constant 0.000000e+00 : f32
    %220 = vector.broadcast %cst_94 : f32 to vector<32x1xf32>
    %c2_i32_95 = arith.constant 2 : i32
    %c0_i32_96 = arith.constant 0 : i32
    %221 = arith.cmpi eq, %c2_i32_95, %c0_i32_96 : i32
    %c1_i32_97 = arith.constant 1 : i32
    %222 = arith.select %221, %c1_i32_97, %c2_i32_95 : i32
    %223 = vector.broadcast %222 : i32 to vector<32x1xi32>
    %224 = arith.remsi %219, %223 : vector<32x1xi32>
    %c0_i32_98 = arith.constant 0 : i32
    %225 = vector.broadcast %c0_i32_98 : i32 to vector<32x1xi32>
    %226 = arith.cmpi ne, %224, %225 : vector<32x1xi32>
    %c0_i32_99 = arith.constant 0 : i32
    %227 = vector.broadcast %c0_i32_99 : i32 to vector<32x1xi32>
    %228 = arith.cmpi slt, %224, %227 : vector<32x1xi32>
    %c0_i32_100 = arith.constant 0 : i32
    %229 = arith.cmpi slt, %222, %c0_i32_100 : i32
    %230 = vector.broadcast %229 : i1 to vector<32x1xi1>
    %231 = vector.broadcast %230 : vector<32x1xi1> to vector<32x1xi1>
    %232 = arith.xori %228, %231 : vector<32x1xi1>
    %233 = arith.andi %232, %226 : vector<32x1xi1>
    %234 = vector.broadcast %222 : i32 to vector<32x1xi32>
    %235 = arith.addi %224, %234 : vector<32x1xi32>
    %236 = arith.select %233, %235, %224 : vector<32x1xi1>, vector<32x1xi32>
    %c0_i32_101 = arith.constant 0 : i32
    %237 = vector.broadcast %c0_i32_101 : i32 to vector<32x1xi32>
    %238 = arith.cmpi eq, %236, %237 : vector<32x1xi32>
    %239 = vector.extract_strided_slice %48 {offsets = [0, 0], sizes = [32, 1], strides = [1, 1]} : vector<32x2xf32> to vector<32x1xf32>
    %cst_102 = arith.constant 0.000000e+00 : f32
    %240 = vector.broadcast %cst_102 : f32 to vector<32x1xf32>
    %241 = arith.select %238, %239, %240 : vector<32x1xi1>, vector<32x1xf32>
    %242 = arith.addf %220, %241 : vector<32x1xf32>
    %c2_i32_103 = arith.constant 2 : i32
    %c0_i32_104 = arith.constant 0 : i32
    %243 = arith.cmpi eq, %c2_i32_103, %c0_i32_104 : i32
    %c1_i32_105 = arith.constant 1 : i32
    %244 = arith.select %243, %c1_i32_105, %c2_i32_103 : i32
    %245 = vector.broadcast %244 : i32 to vector<32x1xi32>
    %246 = arith.remsi %219, %245 : vector<32x1xi32>
    %c0_i32_106 = arith.constant 0 : i32
    %247 = vector.broadcast %c0_i32_106 : i32 to vector<32x1xi32>
    %248 = arith.cmpi ne, %246, %247 : vector<32x1xi32>
    %c0_i32_107 = arith.constant 0 : i32
    %249 = vector.broadcast %c0_i32_107 : i32 to vector<32x1xi32>
    %250 = arith.cmpi slt, %246, %249 : vector<32x1xi32>
    %c0_i32_108 = arith.constant 0 : i32
    %251 = arith.cmpi slt, %244, %c0_i32_108 : i32
    %252 = vector.broadcast %251 : i1 to vector<32x1xi1>
    %253 = vector.broadcast %252 : vector<32x1xi1> to vector<32x1xi1>
    %254 = arith.xori %250, %253 : vector<32x1xi1>
    %255 = arith.andi %254, %248 : vector<32x1xi1>
    %256 = vector.broadcast %244 : i32 to vector<32x1xi32>
    %257 = arith.addi %246, %256 : vector<32x1xi32>
    %258 = arith.select %255, %257, %246 : vector<32x1xi1>, vector<32x1xi32>
    %c1_i32_109 = arith.constant 1 : i32
    %259 = vector.broadcast %c1_i32_109 : i32 to vector<32x1xi32>
    %260 = arith.cmpi eq, %258, %259 : vector<32x1xi32>
    %261 = vector.extract_strided_slice %48 {offsets = [0, 1], sizes = [32, 1], strides = [1, 1]} : vector<32x2xf32> to vector<32x1xf32>
    %cst_110 = arith.constant 0.000000e+00 : f32
    %262 = vector.broadcast %cst_110 : f32 to vector<32x1xf32>
    %263 = arith.select %260, %261, %262 : vector<32x1xi1>, vector<32x1xf32>
    %264 = arith.addf %242, %263 : vector<32x1xf32>
    %265 = vector.extract_strided_slice %264 {offsets = [0, 0], sizes = [16, 1], strides = [1, 1]} : vector<32x1xf32> to vector<16x1xf32>
    %266 = vector.extract_strided_slice %264 {offsets = [16, 0], sizes = [16, 1], strides = [1, 1]} : vector<32x1xf32> to vector<16x1xf32>
    %267 = tpu.concatenate %265, %266 in 1 : vector<16x1xf32>, vector<16x1xf32> -> vector<16x2xf32>
    %cst_111 = arith.constant 5.000000e-01 : f32
    %268 = vector.broadcast %cst_111 : f32 to vector<8x2xf32>
    %269 = arith.mulf %218, %268 : vector<8x2xf32>
    %cst_112 = arith.constant dense<0xFF800000> : vector<2xf32>
    %270 = vector.multi_reduction <maximumf>, %269, %cst_112 [0] : vector<8x2xf32> to vector<2xf32>
    %271 = vector.shape_cast %270 : vector<2xf32> to vector<1x2xf32>
    %272 = vector.broadcast %271 : vector<1x2xf32> to vector<8x2xf32>
    %273 = arith.subf %269, %272 : vector<8x2xf32>
    %274 = math.exp %273 : vector<8x2xf32>
    %cst_113 = arith.constant dense<0.000000e+00> : vector<2xf32>
    %275 = vector.multi_reduction <add>, %274, %cst_113 [0] : vector<8x2xf32> to vector<2xf32>
    %276 = vector.shape_cast %275 : vector<2xf32> to vector<1x2xf32>
    %277 = tpu.reciprocal %276 {approx = true} : vector<1x2xf32> -> vector<1x2xf32>
    %278 = vector.broadcast %277 : vector<1x2xf32> to vector<8x2xf32>
    %279 = arith.mulf %274, %278 : vector<8x2xf32>
    %cst_114 = arith.constant 5.000000e-01 : f32
    %280 = vector.broadcast %cst_114 : f32 to vector<16x2xf32>
    %281 = arith.mulf %267, %280 : vector<16x2xf32>
    %cst_115 = arith.constant dense<0xFF800000> : vector<2xf32>
    %282 = vector.multi_reduction <maximumf>, %281, %cst_115 [0] : vector<16x2xf32> to vector<2xf32>
    %283 = vector.shape_cast %282 : vector<2xf32> to vector<1x2xf32>
    %284 = vector.broadcast %283 : vector<1x2xf32> to vector<16x2xf32>
    %285 = arith.subf %281, %284 : vector<16x2xf32>
    %286 = math.exp %285 : vector<16x2xf32>
    %cst_116 = arith.constant dense<0.000000e+00> : vector<2xf32>
    %287 = vector.multi_reduction <add>, %286, %cst_116 [0] : vector<16x2xf32> to vector<2xf32>
    %288 = vector.shape_cast %287 : vector<2xf32> to vector<1x2xf32>
    %289 = tpu.reciprocal %288 {approx = true} : vector<1x2xf32> -> vector<1x2xf32>
    %290 = vector.broadcast %289 : vector<1x2xf32> to vector<16x2xf32>
    %291 = arith.mulf %286, %290 : vector<16x2xf32>
    %c0_117 = arith.constant 0 : index
    %c0_118 = arith.constant 0 : index
    %292 = vector.load %arg6[%c0_117, %c0_118] : memref<16x8xf32, #tpu.memory_space<vmem>>, vector<16x8xf32>
    %cst_119 = arith.constant dense<0.000000e+00> : vector<16x8xf32>
    %293 = tpu.matmul %292, %116, %cst_119 {dimension_numbers = #tpu.dot_dimension_numbers<[1], [0], [0], [1], [0, 0, 1, 1], [], []>} : vector<16x8xf32>, vector<8x8xf32>, vector<16x8xf32> -> vector<16x8xf32>
    %c0_120 = arith.constant 0 : index
    %c0_121 = arith.constant 0 : index
    %294 = vector.load %arg7[%c0_120, %c0_121] : memref<8x16xf32, #tpu.memory_space<vmem>>, vector<8x16xf32>
    %295 = vector.extract_strided_slice %291 {offsets = [0, 0], sizes = [16, 1], strides = [1, 1]} : vector<16x2xf32> to vector<16x1xf32>
    %296 = vector.shape_cast %295 : vector<16x1xf32> to vector<16x1xf32>
    %297 = vector.broadcast %296 : vector<16x1xf32> to vector<16x4xf32>
    %298 = vector.extract_strided_slice %291 {offsets = [0, 1], sizes = [16, 1], strides = [1, 1]} : vector<16x2xf32> to vector<16x1xf32>
    %299 = vector.shape_cast %298 : vector<16x1xf32> to vector<16x1xf32>
    %300 = vector.broadcast %299 : vector<16x1xf32> to vector<16x4xf32>
    %301 = tpu.concatenate %297, %300 in 1 : vector<16x4xf32>, vector<16x4xf32> -> vector<16x8xf32>
    %302 = arith.mulf %293, %301 : vector<16x8xf32>
    %cst_122 = arith.constant dense<0.000000e+00> : vector<8x8xf32>
    %303 = tpu.matmul %294, %302, %cst_122 {dimension_numbers = #tpu.dot_dimension_numbers<[1], [0], [0], [1], [0, 0, 1, 1], [], []>} : vector<8x16xf32>, vector<16x8xf32>, vector<8x8xf32> -> vector<8x8xf32>
    %304 = arith.mulf %303, %116 : vector<8x8xf32>
    %305 = vector.extract_strided_slice %304 {offsets = [0, 0], sizes = [8, 4], strides = [1, 1]} : vector<8x8xf32> to vector<8x4xf32>
    %306 = vector.extract_strided_slice %304 {offsets = [0, 4], sizes = [8, 4], strides = [1, 1]} : vector<8x8xf32> to vector<8x4xf32>
    %307 = arith.addf %305, %306 : vector<8x4xf32>
    %c0_123 = arith.constant 0 : index
    %c0_124 = arith.constant 0 : index
    %308 = vector.load %arg10[%c0_123, %c0_124] : memref<32x8xf32, #tpu.memory_space<vmem>>, vector<32x8xf32>
    %cst_125 = arith.constant dense<0.000000e+00> : vector<32x2xf32>
    %309 = tpu.matmul %308, %279, %cst_125 {dimension_numbers = #tpu.dot_dimension_numbers<[1], [0], [0], [1], [0, 0, 1, 1], [], []>} : vector<32x8xf32>, vector<8x2xf32>, vector<32x2xf32> -> vector<32x2xf32>
    %c0_126 = arith.constant 0 : index
    %c0_127 = arith.constant 0 : index
    %310 = vector.load %arg8[%c0_126, %c0_127] : memref<32x16xf32, #tpu.memory_space<vmem>>, vector<32x16xf32>
    %cst_128 = arith.constant dense<0.000000e+00> : vector<32x8xf32>
    %311 = tpu.matmul %310, %169, %cst_128 {dimension_numbers = #tpu.dot_dimension_numbers<[1], [0], [0], [1], [0, 0, 1, 1], [], []>} : vector<32x16xf32>, vector<16x8xf32>, vector<32x8xf32> -> vector<32x8xf32>
    %c0_129 = arith.constant 0 : index
    %c0_130 = arith.constant 0 : index
    %312 = vector.load %arg9[%c0_129, %c0_130] : memref<16x32xf32, #tpu.memory_space<vmem>>, vector<16x32xf32>
    %313 = vector.extract_strided_slice %309 {offsets = [0, 0], sizes = [32, 1], strides = [1, 1]} : vector<32x2xf32> to vector<32x1xf32>
    %314 = vector.shape_cast %313 : vector<32x1xf32> to vector<32x1xf32>
    %315 = vector.broadcast %314 : vector<32x1xf32> to vector<32x4xf32>
    %316 = vector.extract_strided_slice %309 {offsets = [0, 1], sizes = [32, 1], strides = [1, 1]} : vector<32x2xf32> to vector<32x1xf32>
    %317 = vector.shape_cast %316 : vector<32x1xf32> to vector<32x1xf32>
    %318 = vector.broadcast %317 : vector<32x1xf32> to vector<32x4xf32>
    %319 = tpu.concatenate %315, %318 in 1 : vector<32x4xf32>, vector<32x4xf32> -> vector<32x8xf32>
    %320 = arith.mulf %311, %319 : vector<32x8xf32>
    %cst_131 = arith.constant dense<0.000000e+00> : vector<16x8xf32>
    %321 = tpu.matmul %312, %320, %cst_131 {dimension_numbers = #tpu.dot_dimension_numbers<[1], [0], [0], [1], [0, 0, 1, 1], [], []>} : vector<16x32xf32>, vector<32x8xf32>, vector<16x8xf32> -> vector<16x8xf32>
    %322 = arith.mulf %321, %169 : vector<16x8xf32>
    %323 = vector.extract_strided_slice %322 {offsets = [0, 0], sizes = [16, 4], strides = [1, 1]} : vector<16x8xf32> to vector<16x4xf32>
    %324 = vector.extract_strided_slice %322 {offsets = [0, 4], sizes = [16, 4], strides = [1, 1]} : vector<16x8xf32> to vector<16x4xf32>
    %325 = arith.addf %323, %324 : vector<16x4xf32>
    %326 = arith.addf %307, %0 : vector<8x4xf32>
    %cst_132 = arith.constant dense<0.000000e+00> : vector<8xf32>
    %327 = vector.multi_reduction <add>, %326, %cst_132 [1] : vector<8x4xf32> to vector<8xf32>
    %328 = vector.shape_cast %327 : vector<8xf32> to vector<8x1xf32>
    %cst_133 = arith.constant 4.000000e+00 : f32
    %329 = vector.broadcast %cst_133 : f32 to vector<8x1xf32>
    %330 = arith.divf %328, %329 : vector<8x1xf32>
    %331 = vector.broadcast %330 : vector<8x1xf32> to vector<8x4xf32>
    %332 = arith.subf %326, %331 : vector<8x4xf32>
    %333 = arith.mulf %332, %332 : vector<8x4xf32>
    %cst_134 = arith.constant dense<0.000000e+00> : vector<8xf32>
    %334 = vector.multi_reduction <add>, %333, %cst_134 [1] : vector<8x4xf32> to vector<8xf32>
    %335 = vector.shape_cast %334 : vector<8xf32> to vector<8x1xf32>
    %cst_135 = arith.constant 4.000000e+00 : f32
    %336 = vector.broadcast %cst_135 : f32 to vector<8x1xf32>
    %337 = arith.divf %335, %336 : vector<8x1xf32>
    %338 = vector.broadcast %330 : vector<8x1xf32> to vector<8x4xf32>
    %339 = arith.subf %326, %338 : vector<8x4xf32>
    %cst_136 = arith.constant 9.99999974E-6 : f32
    %340 = vector.broadcast %cst_136 : f32 to vector<8x1xf32>
    %341 = arith.addf %337, %340 : vector<8x1xf32>
    %342 = math.rsqrt %341 : vector<8x1xf32>
    %343 = vector.broadcast %342 : vector<8x1xf32> to vector<8x4xf32>
    %344 = arith.mulf %339, %343 : vector<8x4xf32>
    %c10 = arith.constant 10 : index
    %c0_137 = arith.constant 0 : index
    %345 = vector.load %arg12[%c10, %c0_137] : memref<24x32xf32, #tpu.memory_space<vmem>>, vector<1x4xf32>
    %346 = vector.broadcast %345 : vector<1x4xf32> to vector<8x4xf32>
    %347 = arith.mulf %344, %346 : vector<8x4xf32>
    %c11 = arith.constant 11 : index
    %c0_138 = arith.constant 0 : index
    %348 = vector.load %arg12[%c11, %c0_138] : memref<24x32xf32, #tpu.memory_space<vmem>>, vector<1x4xf32>
    %349 = vector.broadcast %348 : vector<1x4xf32> to vector<8x4xf32>
    %350 = arith.addf %347, %349 : vector<8x4xf32>
    %c112 = arith.constant 112 : index
    %c0_139 = arith.constant 0 : index
    %351 = vector.load %arg11[%c112, %c0_139] : memref<128x32xf32, #tpu.memory_space<vmem>>, vector<4x8xf32>
    %cst_140 = arith.constant dense<0.000000e+00> : vector<8x8xf32>
    %352 = tpu.matmul %350, %351, %cst_140 {dimension_numbers = #tpu.dot_dimension_numbers<[1], [0], [0], [1], [0, 0, 1, 1], [], []>} : vector<8x4xf32>, vector<4x8xf32>, vector<8x8xf32> -> vector<8x8xf32>
    %c8_141 = arith.constant 8 : index
    %c0_142 = arith.constant 0 : index
    %353 = vector.load %arg12[%c8_141, %c0_142] : memref<24x32xf32, #tpu.memory_space<vmem>>, vector<1x8xf32>
    %354 = vector.broadcast %353 : vector<1x8xf32> to vector<8x8xf32>
    %355 = arith.addf %352, %354 : vector<8x8xf32>
    %cst_143 = arith.constant 0.000000e+00 : f32
    %356 = vector.broadcast %cst_143 : f32 to vector<8x8xf32>
    %357 = arith.maximumf %355, %356 : vector<8x8xf32>
    %cst_144 = arith.constant dense<0.000000e+00> : vector<8xf32>
    %358 = vector.multi_reduction <add>, %357, %cst_144 [1] : vector<8x8xf32> to vector<8xf32>
    %359 = vector.shape_cast %358 : vector<8xf32> to vector<8x1xf32>
    %cst_145 = arith.constant 8.000000e+00 : f32
    %360 = vector.broadcast %cst_145 : f32 to vector<8x1xf32>
    %361 = arith.divf %359, %360 : vector<8x1xf32>
    %362 = vector.broadcast %361 : vector<8x1xf32> to vector<8x8xf32>
    %363 = arith.subf %357, %362 : vector<8x8xf32>
    %364 = arith.mulf %363, %363 : vector<8x8xf32>
    %cst_146 = arith.constant dense<0.000000e+00> : vector<8xf32>
    %365 = vector.multi_reduction <add>, %364, %cst_146 [1] : vector<8x8xf32> to vector<8xf32>
    %366 = vector.shape_cast %365 : vector<8xf32> to vector<8x1xf32>
    %cst_147 = arith.constant 8.000000e+00 : f32
    %367 = vector.broadcast %cst_147 : f32 to vector<8x1xf32>
    %368 = arith.divf %366, %367 : vector<8x1xf32>
    %369 = vector.broadcast %361 : vector<8x1xf32> to vector<8x8xf32>
    %370 = arith.subf %357, %369 : vector<8x8xf32>
    %cst_148 = arith.constant 9.99999974E-6 : f32
    %371 = vector.broadcast %cst_148 : f32 to vector<8x1xf32>
    %372 = arith.addf %368, %371 : vector<8x1xf32>
    %373 = math.rsqrt %372 : vector<8x1xf32>
    %374 = vector.broadcast %373 : vector<8x1xf32> to vector<8x8xf32>
    %375 = arith.mulf %370, %374 : vector<8x8xf32>
    %c12 = arith.constant 12 : index
    %c0_149 = arith.constant 0 : index
    %376 = vector.load %arg12[%c12, %c0_149] : memref<24x32xf32, #tpu.memory_space<vmem>>, vector<1x8xf32>
    %377 = vector.broadcast %376 : vector<1x8xf32> to vector<8x8xf32>
    %378 = arith.mulf %375, %377 : vector<8x8xf32>
    %c13 = arith.constant 13 : index
    %c0_150 = arith.constant 0 : index
    %379 = vector.load %arg12[%c13, %c0_150] : memref<24x32xf32, #tpu.memory_space<vmem>>, vector<1x8xf32>
    %380 = vector.broadcast %379 : vector<1x8xf32> to vector<8x8xf32>
    %381 = arith.addf %378, %380 : vector<8x8xf32>
    %c0_151 = arith.constant 0 : index
    %c0_152 = arith.constant 0 : index
    %382 = vector.load %arg13[%c0_151, %c0_152] : memref<8x8xf32, #tpu.memory_space<vmem>>, vector<8x8xf32>
    tpu.vector_store %arg13[%c0_151, %c0_152], %381 {strides = array<i32>} : memref<8x8xf32, #tpu.memory_space<vmem>>, vector<8x8xf32>,
    %383 = arith.addf %325, %1 : vector<16x4xf32>
    %cst_153 = arith.constant dense<0.000000e+00> : vector<16xf32>
    %384 = vector.multi_reduction <add>, %383, %cst_153 [1] : vector<16x4xf32> to vector<16xf32>
    %385 = vector.shape_cast %384 : vector<16xf32> to vector<16x1xf32>
    %cst_154 = arith.constant 4.000000e+00 : f32
    %386 = vector.broadcast %cst_154 : f32 to vector<16x1xf32>
    %387 = arith.divf %385, %386 : vector<16x1xf32>
    %388 = vector.broadcast %387 : vector<16x1xf32> to vector<16x4xf32>
    %389 = arith.subf %383, %388 : vector<16x4xf32>
    %390 = arith.mulf %389, %389 : vector<16x4xf32>
    %cst_155 = arith.constant dense<0.000000e+00> : vector<16xf32>
    %391 = vector.multi_reduction <add>, %390, %cst_155 [1] : vector<16x4xf32> to vector<16xf32>
    %392 = vector.shape_cast %391 : vector<16xf32> to vector<16x1xf32>
    %cst_156 = arith.constant 4.000000e+00 : f32
    %393 = vector.broadcast %cst_156 : f32 to vector<16x1xf32>
    %394 = arith.divf %392, %393 : vector<16x1xf32>
    %395 = vector.broadcast %387 : vector<16x1xf32> to vector<16x4xf32>
    %396 = arith.subf %383, %395 : vector<16x4xf32>
    %cst_157 = arith.constant 9.99999974E-6 : f32
    %397 = vector.broadcast %cst_157 : f32 to vector<16x1xf32>
    %398 = arith.addf %394, %397 : vector<16x1xf32>
    %399 = math.rsqrt %398 : vector<16x1xf32>
    %400 = vector.broadcast %399 : vector<16x1xf32> to vector<16x4xf32>
    %401 = arith.mulf %396, %400 : vector<16x4xf32>
    %c14 = arith.constant 14 : index
    %c0_158 = arith.constant 0 : index
    %402 = vector.load %arg12[%c14, %c0_158] : memref<24x32xf32, #tpu.memory_space<vmem>>, vector<1x4xf32>
    %403 = vector.broadcast %402 : vector<1x4xf32> to vector<16x4xf32>
    %404 = arith.mulf %401, %403 : vector<16x4xf32>
    %c15 = arith.constant 15 : index
    %c0_159 = arith.constant 0 : index
    %405 = vector.load %arg12[%c15, %c0_159] : memref<24x32xf32, #tpu.memory_space<vmem>>, vector<1x4xf32>
    %406 = vector.broadcast %405 : vector<1x4xf32> to vector<16x4xf32>
    %407 = arith.addf %404, %406 : vector<16x4xf32>
    %c120 = arith.constant 120 : index
    %c0_160 = arith.constant 0 : index
    %408 = vector.load %arg11[%c120, %c0_160] : memref<128x32xf32, #tpu.memory_space<vmem>>, vector<4x8xf32>
    %cst_161 = arith.constant dense<0.000000e+00> : vector<16x8xf32>
    %409 = tpu.matmul %407, %408, %cst_161 {dimension_numbers = #tpu.dot_dimension_numbers<[1], [0], [0], [1], [0, 0, 1, 1], [], []>} : vector<16x4xf32>, vector<4x8xf32>, vector<16x8xf32> -> vector<16x8xf32>
    %c9 = arith.constant 9 : index
    %c0_162 = arith.constant 0 : index
    %410 = vector.load %arg12[%c9, %c0_162] : memref<24x32xf32, #tpu.memory_space<vmem>>, vector<1x8xf32>
    %411 = vector.broadcast %410 : vector<1x8xf32> to vector<16x8xf32>
    %412 = arith.addf %409, %411 : vector<16x8xf32>
    %cst_163 = arith.constant 0.000000e+00 : f32
    %413 = vector.broadcast %cst_163 : f32 to vector<16x8xf32>
    %414 = arith.maximumf %412, %413 : vector<16x8xf32>
    %cst_164 = arith.constant dense<0.000000e+00> : vector<16xf32>
    %415 = vector.multi_reduction <add>, %414, %cst_164 [1] : vector<16x8xf32> to vector<16xf32>
    %416 = vector.shape_cast %415 : vector<16xf32> to vector<16x1xf32>
    %cst_165 = arith.constant 8.000000e+00 : f32
    %417 = vector.broadcast %cst_165 : f32 to vector<16x1xf32>
    %418 = arith.divf %416, %417 : vector<16x1xf32>
    %419 = vector.broadcast %418 : vector<16x1xf32> to vector<16x8xf32>
    %420 = arith.subf %414, %419 : vector<16x8xf32>
    %421 = arith.mulf %420, %420 : vector<16x8xf32>
    %cst_166 = arith.constant dense<0.000000e+00> : vector<16xf32>
    %422 = vector.multi_reduction <add>, %421, %cst_166 [1] : vector<16x8xf32> to vector<16xf32>
    %423 = vector.shape_cast %422 : vector<16xf32> to vector<16x1xf32>
    %cst_167 = arith.constant 8.000000e+00 : f32
    %424 = vector.broadcast %cst_167 : f32 to vector<16x1xf32>
    %425 = arith.divf %423, %424 : vector<16x1xf32>
    %426 = vector.broadcast %418 : vector<16x1xf32> to vector<16x8xf32>
    %427 = arith.subf %414, %426 : vector<16x8xf32>
    %cst_168 = arith.constant 9.99999974E-6 : f32
    %428 = vector.broadcast %cst_168 : f32 to vector<16x1xf32>
    %429 = arith.addf %425, %428 : vector<16x1xf32>
    %430 = math.rsqrt %429 : vector<16x1xf32>
    %431 = vector.broadcast %430 : vector<16x1xf32> to vector<16x8xf32>
    %432 = arith.mulf %427, %431 : vector<16x8xf32>
    %c16_169 = arith.constant 16 : index
    %c0_170 = arith.constant 0 : index
    %433 = vector.load %arg12[%c16_169, %c0_170] : memref<24x32xf32, #tpu.memory_space<vmem>>, vector<1x8xf32>
    %434 = vector.broadcast %433 : vector<1x8xf32> to vector<16x8xf32>
    %435 = arith.mulf %432, %434 : vector<16x8xf32>
    %c17 = arith.constant 17 : index
    %c0_171 = arith.constant 0 : index
    %436 = vector.load %arg12[%c17, %c0_171] : memref<24x32xf32, #tpu.memory_space<vmem>>, vector<1x8xf32>
    %437 = vector.broadcast %436 : vector<1x8xf32> to vector<16x8xf32>
    %438 = arith.addf %435, %437 : vector<16x8xf32>
    %c0_172 = arith.constant 0 : index
    %c0_173 = arith.constant 0 : index
    %439 = vector.load %arg14[%c0_172, %c0_173] : memref<16x8xf32, #tpu.memory_space<vmem>>, vector<16x8xf32>
    tpu.vector_store %arg14[%c0_172, %c0_173], %438 {strides = array<i32>} : memref<16x8xf32, #tpu.memory_space<vmem>>, vector<16x8xf32>,
    return
  }
}

</mosaic_0001>

<bundles_post_ra>
// kernel: mutual_attention_transformer_layer.1
= control target key start
LH: loop header
LB: loop body
LE: loop exit
PB: predicated region body
PF: predicated region fallthrough
CT: control target
= control target key end

     0   :  { %vm52_vm0 = vcmask 64512   ;;  %s3103_s0 = inlined_call_operand.vmem [shape: f32[8,4], index: 0, kind: input, shape index: {}]   ;;  %s3104_s1 = inlined_call_operand.vmem [shape: f32[16,4], index: 1, kind: input, shape index: {}]   ;;  %s3105_s2 = inlined_call_operand.vmem [shape: f32[16,4], index: 2, kind: input, shape index: {}]   ;;  %s3106_s3 = inlined_call_operand.vmem [shape: f32[32,4], index: 3, kind: input, shape index: {}]   ;;  %s3107_s4 = inlined_call_operand.vmem [shape: f32[16,8], index: 4, kind: input, shape index: {}]   ;;  %s3108_s5 = inlined_call_operand.vmem [shape: f32[32,16], index: 5, kind: input, shape index: {}]   ;;  %s3109_s6 = inlined_call_operand.vmem [shape: f32[16,8], index: 6, kind: input, shape index: {}]   ;;  %s3110_s7 = inlined_call_operand.vmem [shape: f32[8,16], index: 7, kind: input, shape index: {}]   ;;  %s3111_s8 = inlined_call_operand.vmem [shape: f32[32,16], index: 8, kind: input, shape index: {}]   ;;  %s3112_s9 = inlined_call_operand.vmem [shape: f32[16,32], index: 9, kind: input, shape index: {}]   ;;  %s3113_s10 = inlined_call_operand.vmem [shape: f32[32,8], index: 10, kind: input, shape index: {}]   ;;  %s3114_s11 = inlined_call_operand.vmem [shape: f32[128,32], index: 11, kind: input, shape index: {}]   ;;  %s3115_s12 = inlined_call_operand.vmem [shape: f32[24,32], index: 12, kind: input, shape index: {}]   ;;  %s3116_s13 = inlined_call_operand.hbm [shape: f32[8,8], index: 13, kind: output, shape index: {0}]   ;;  %s3117_s14 = inlined_call_operand.vmem [shape: f32[16,8], index: 14, kind: output, shape index: {1}]  }
   0x1   :  { %v2622_v0 = vld [vmem:[%s3103_s0] sm:$0xff]  ;;  %v51_v2 = vld [vmem:[%s3107_s4 + $0x8] sm:$0xff] }
   0x2   :  { %v50_v1 = vld [vmem:[%s3107_s4] sm:$0xff]  ;;  %2303 = vmatprep.subr.mxu0 %v2622_v0 }
   0x3   :  { %2305 = vmatprep.mubr.msk.f32.mxu0 %vm52_vm0, %v50_v1 }
   0x4   :  { %20 = vsyncpa [#allocation3], 0  ;;  %2304 = vmatpush3.msra.mxu0 %v2622_v0  ;;  %v134_v3 = vld [vmem:[%s3114_s11] sm:$0xf]  ;;  %vm147_vm1 = vcmask 1043456   ;;  %v2651_v6 = vld [vmem:[%s3104_s1 + $0x8] sm:$0xff]  ;;  %v1047_v48 = vlaneseq }
   0x5   :  { %2306 = vmatmul.mubr.msk.f32.vlgmr.msra.gmra.mrb[0].mxu0 %vm52_vm0, %v51_v2  ;;  %2308 = vmatprep.subr.msk.mxu1 %vm147_vm1, %v134_v3  ;;  %v319_v4 = vld [vmem:[%s3114_s11 + $0x10] sm:$0xf]  ;;  %v2646_v5 = vld [vmem:[%s3104_s1] sm:$0xff]  ;;  %vm140_vm2 = vcmask 31744   ;;  %v318_v11 = vld [vmem:[%s3105_s2 + $0x8] sm:$0xff]  ;;  %vm508_vm3 = vcmask 130048  }
   0x6   :  { %2309 = vmatpush3.msk.msra.mxu1 %vm147_vm1, %v134_v3  ;;  %v317_v9 = vld [vmem:[%s3105_s2] sm:$0xff]  ;;  %v2441_v10 = vpack.c.bf16 %v2651_v6, %v2646_v5  ;;  %v505_v13 = vld [vmem:[%s3108_s5 + $0x8] sm:$0xff]  ;;  %v506_v14 = vld [vmem:[%s3108_s5 + $0x10] sm:$0xff]  ;;  %vm420_vm4 = vcmask 261120   ;;  %v2747_v51 = vshrl.u32 %v1047_v48, 7  ;;  %s2534_s15 = smov 124  }
   0x7   :  { %2318 = vmatprep.subr.msk.mxu1 %vm147_vm1, %v319_v4  ;;  %v504_v12 = vld [vmem:[%s3108_s5] sm:$0xff]  ;;  %v507_v15 = vld [vmem:[%s3108_s5 + $0x18] sm:$0xff]  ;;  %v228_v16 = vld [vmem:[%s3114_s11 + $0x8] sm:$0xff]  ;;  %s2535_s20 = smov 4   ;;  %vm1207_vm13 = vcmask 7168   ;;  %vm1252_vm14 = vcmask 15360  }
   0x8   :  { %v411_v17 = vld [vmem:[%s3114_s11 + $0x18] sm:$0xff]  ;;  %v412_v18 = vld [vmem:[%s3114_s11 + $0x20] sm:$0xff]  ;;  %2313 = vmatprep.subr.mxu0 %v228_v16  ;;  %v413_v25 = vld [vmem:[%s3114_s11 + $0x28] sm:$0xff]  ;;  %v1049_v54 = vadd.s32 8, %v2747_v51  ;;  %vm2541_vm15 = vmmov 0   ;;  %s2543_s4 = smov [#allocation2]  }
   0x9   :  { %v2433_v19 = vpack.c.bf16 %v412_v18, %v411_v17  ;;  %2314 = vmatpush3.msra.mxu0 %v228_v16  ;;  %v2160_v20 = vld [vmem:[%s3115_s12] ss:$0 sm:$0xff]  ;;  %v414_v26 = vld [vmem:[%s3114_s11 + $0x30] sm:$0xff]  ;;  %v2167_v27 = vld [vmem:[%s3115_s12 + $0x2] ss:$0 sm:$0xff]  ;;  %s2146_s21 = sshll.u32 %s2543_s4, 4  ;;  %s2147_s21 = int_to_ptr.vmem [resolvable:$true] %s2146_s21 }
   0xa   :  { %v2437_v32 = vpack.c.bf16 %v414_v26, %v413_v25  ;;  %v606_v38 = vld [vmem:[%s3114_s11 + $0x38] sm:$0xf]  ;;  %v827_v42 = vld [vmem:[%s3114_s11 + $0x48] sm:$0xf]  ;;  %v823_v43 = vld [vmem:[%s3106_s3] sm:$0xff]  ;;  %v1061_v60 = vand.u32 1, %v1049_v54  ;;  %p2515_p1 = scmp.lt.s32.totalorder %s2147_s21, %s2147_s21 }
   0xb   :  { %2434 = vmatprep.subr.bf16.mxu0 %v2433_v19  ;;  %v824_v44 = vld [vmem:[%s3106_s3 + $0x8] sm:$0xff]  ;;  %v825_v45 = vld [vmem:[%s3106_s3 + $0x10] sm:$0xff]  ;;  %v826_v46 = vld [vmem:[%s3106_s3 + $0x18] sm:$0xff]  ;;  %s2536_s3 = smov 127   ;;  %s2510_s22 = scalar_lea.vmem %s2147_s21, 128 }
   0xc   :  { %v716_v47 = vld [vmem:[%s3114_s11 + $0x40] sm:$0xff]  ;;  %v937_v55 = vld [vmem:[%s3114_s11 + $0x50] sm:$0xff]  ;;  %v938_v56 = vld [vmem:[%s3114_s11 + $0x58] sm:$0xff]  ;;  %vm2767_vm5 = vcmp.eq.s32.totalorder %v1061_v60, 1  ;;  %vm2804_vm7 = vcmp.eq.s32.totalorder %v1061_v60, 0  ;;  %p2511_p0 = scmp.ne.s32.totalorder %s2147_s21, %s2510_s22  ;;  %p2516_p2 = scmp.lt.s32.totalorder %s2510_s22, %s2510_s22 }
   0xd   :  { %v2743_v49 = vld [vmem:[%s3115_s12 + $0x1] ss:$0 sm:$0xff]  ;;  %v2171_v57 = vld [vmem:[%s3115_s12 + $0x3] ss:$0 sm:$0xff]  ;;  %v2445_v58 = vpack.c.bf16 %v938_v56, %v937_v55  ;;  %v2178_v1 = vld [vmem:[%s3115_s12 + $0x4] ss:$0 sm:$0xff] }
   0xe   :  { %p2517_p3 = por %p2516_p2, %p2515_p1 }
  0x10   :  { %p2518_p4 = pnand %p2517_p3, %p2511_p0 }
  0xd8   :  { %v2307_v7 = vpop.f32.mrb[0].mxu0 }
  0xd9   :  { %v125_v8 = vpop.f32.mrb[1].mxu0 }
  0xda   :  { %2310 = vmatprep.mubr.msk.f32.mxu1 %vm140_vm2, %v125_v8 }
  0xdb   :  { %2311 = vmatmul.mubr.msk.f32.vlgmr.msra.gmra.mrb[0].mxu1 %vm140_vm2, %v2307_v7  ;;  %v1054_v7 = vand.u32 1, %v2747_v51 }
  0xdc   :  { %2319 = vmatpush3.msk.msra.mxu1 %vm147_vm1, %v319_v4  ;;  %2320 = vmatprep.mubr.msk.f32.mxu1 %vm140_vm2, %v317_v9 }
  0xdd   :  { %2442 = vmatprep.subr.bf16.mxu1 %v2441_v10  ;;  %vm2784_vm6 = vcmp.eq.s32.totalorder %v1054_v7, 1  ;;  %vm2848_vm10 = vcmp.eq.s32.totalorder %v1054_v7, 0 }
  0xdf   :  { %2321 = vmatmul.mubr.msk.f32.vlgmr.msra.gmra.mrb[2].mxu1 %vm140_vm2, %v318_v11 }
  0xe0   :  { %2444 = vmatpush3.bf16.msra.mxu1 %v2441_v10  ;;  %2338 = vmatprep.mubr.msk.f32.mxu1 %vm508_vm3, %v504_v12 }
  0xe1   :  { %2352 = vmatprep.subr.mxu1 %v716_v47 }
  0xe3   :  { %2339 = vmatmul.mubr.msk.f32.vlgmr.msra.gmra.mrb[4].mxu1 %vm508_vm3, %v505_v13  ;;  %v939_v13 = vld [vmem:[%s3114_s11 + $0x60] sm:$0xff] }
  0xe4   :  { %2341 = vmatprep.mubr.msk.f32.mxu1 %vm508_vm3, %v506_v14  ;;  %2353 = vmatpush3.msra.mxu1 %v716_v47  ;;  %v940_v14 = vld [vmem:[%s3114_s11 + $0x68] sm:$0xff]  ;;  %v2184_v47 = vld [vmem:[%s3115_s12 + $0x5] ss:$0 sm:$0xff] }
  0xe5   :  { %2446 = vmatprep.subr.bf16.mxu1 %v2445_v58 }
  0xe7   :  { %2342 = vmatmul.mubr.msk.f32.gmra.mrb[6].mxu1 %vm508_vm3, %v507_v15 }
 0x1ae   :  { %v2312_v21 = vpop.f32.mrb[0].mxu1 }
 0x1af   :  { %v223_v22 = vadd.f32 %v2312_v21, %v2160_v20  ;;  %v217_v23 = vpop.f32.mrb[1].mxu1 }
 0x1b0   :  { %v218_v24 = vadd.f32 %v2160_v20, %v217_v23 }
 0x1b1   :  { %v227_v30 = vmax.f32 %v223_v22, 0.0  ;;  %v2449_v22 = vpack.c.bf16 %v940_v14, %v939_v13 }
 0x1b2   :  { %v226_v28 = vmax.f32 %v218_v24, 0.0  ;;  %v2322_v29 = vpop.f32.mrb[2].mxu1  ;;  %v2189_v24 = vld [vmem:[%s3115_s12 + $0x6] ss:$0 sm:$0xff] }
 0x1b3   :  { %v400_v31 = vpop.f32.mrb[3].mxu1  ;;  %v406_v36 = vadd.f32 %v2322_v29, %v2167_v27 }
 0x1b4   :  { %2315 = vmatprep.mubr.msk.f32.mxu0 %vm52_vm0, %v226_v28  ;;  %v401_v33 = vadd.f32 %v2167_v27, %v400_v31 }
 0x1b5   :  { %2316 = vmatmul.mubr.msk.f32.vlgmr.msra.gmra.mrb[2].mxu0 %vm52_vm0, %v227_v30  ;;  %v410_v40 = vmax.f32 %v406_v36, 0.0 }
 0x1b6   :  { %v409_v34 = vmax.f32 %v401_v33, 0.0  ;;  %2436 = vmatpush3.bf16.msra.mxu0 %v2433_v19  ;;  %v2340_v35 = vpop.f32.mrb[4].mxu1 }
 0x1b7   :  { %2438 = vmatprep.subr.bf16.mxu0 %v2437_v32  ;;  %v587_v37 = vpop.f32.mrb[5].mxu1 }
 0x1b8   :  { %2331 = vmatprep.mubr.msk.f32.mxu0 %vm420_vm4, %v409_v34 }
 0x1ba   :  { %2440 = vmatpush3.bf16.msra.mxu0 %v2437_v32  ;;  %v2343_v39 = vpop.f32.mrb[6].mxu1 }
 0x1bb   :  { %2344 = vmatprep.subr.msk.mxu0 %vm147_vm1, %v606_v38  ;;  %v597_v41 = vpop.f32.mrb[7].mxu1 }
 0x1bd   :  { %2332 = vmatmul.mubr.msk.f32.vlgmr.msra.gmra.mrb[4].mxu0 %vm420_vm4, %v410_v40 }
 0x1be   :  { %2345 = vmatpush3.msk.msra.mxu0 %vm147_vm1, %v606_v38  ;;  %2346 = vmatprep.mubr.msk.f32.mxu0 %vm140_vm2, %v587_v37 }
 0x1bf   :  { %2360 = vmatprep.subr.msk.mxu0 %vm147_vm1, %v827_v42 }
 0x1c1   :  { %2347 = vmatmul.mubr.msk.f32.vlgmr.msra.gmra.mrb[6].mxu0 %vm140_vm2, %v2340_v35 }
 0x1c2   :  { %2349 = vmatprep.mubr.msk.f32.mxu0 %vm140_vm2, %v597_v41  ;;  %2361 = vmatpush3.msk.msra.mxu0 %vm147_vm1, %v827_v42 }
 0x1c5   :  { %2350 = vmatmul.mubr.msk.f32.gmra.mrb[8].mxu0 %vm140_vm2, %v2343_v39  ;;  %v1588_v39 = vld [vmem:[%s3111_s8 + $0x8] sm:$0xff] }
 0x1c6   :  { %2362 = vmatprep.mubr.msk.f32.mxu0 %vm140_vm2, %v823_v43  ;;  %v1108_v43 = vadd.s32 24, %v2747_v51 }
 0x1c8   :  { %v1120_v48 = vand.u32 1, %v1108_v43 }
 0x1c9   :  { %2363 = vmatmul.mubr.msk.f32.vlgmr.msra.gmra.mrb[10].mxu0 %vm140_vm2, %v824_v44  ;;  %v1107_v44 = vadd.s32 16, %v2747_v51 }
 0x1ca   :  { %2365 = vmatprep.mubr.msk.f32.mxu0 %vm140_vm2, %v825_v45  ;;  %vm2820_vm8 = vcmp.eq.s32.totalorder %v1120_v48, 1  ;;  %vm2876_vm11 = vcmp.eq.s32.totalorder %v1120_v48, 0 }
 0x1cd   :  { %2366 = vmatmul.mubr.msk.f32.gmra.mrb[12].mxu0 %vm140_vm2, %v826_v46 }
 0x288   :  { %v2745_v50 = vpop.f32.mrb[2].mxu0 }
 0x289   :  { %v306_v52 = vpop.f32.mrb[3].mxu0 }
 0x28a   :  { %v2750_v53 = vadd.f32 %v2743_v49, %v306_v52  ;;  %v1113_v52 = vand.u32 1, %v1107_v44 }
 0x28c   :  { %vm2824_vm9 = vcmp.eq.s32.totalorder %v1113_v52, 1  ;;  %vm2880_vm12 = vcmp.eq.s32.totalorder %v1113_v52, 0 }
 0x290   :  { %v2333_v59 = vpop.f32.mrb[4].mxu0 }
 0x291   :  { %v499_v61 = vadd.f32 %v2333_v59, %v2171_v57  ;;  %v493_v62 = vpop.f32.mrb[5].mxu0 }
 0x292   :  { %v2762_v63 = vadd.f32 %v2171_v57, %v493_v62 }
 0x293   :  { %v503_v2 = vmax.f32 %v499_v61, 0.0 }
 0x294   :  { %v2348_v3 = vpop.f32.mrb[6].mxu0  ;;  %v502_v8 = vmax.f32 %v2762_v63, 0.0 }
 0x295   :  { %v699_v9 = vadd.f32 %v2348_v3, %v2178_v1  ;;  %v693_v10 = vpop.f32.mrb[7].mxu0  ;;  %v1091_v11 = vsel %vm2767_vm5, %v503_v2, 0.0  ;;  %v1081_v41 = vsel %vm2804_vm7, %v503_v2, 0.0  ;;  %v2195_v3 = vld [vmem:[%s3115_s12 + $0x7] ss:$0 sm:$0xff] }
 0x296   :  { %v694_v12 = vadd.f32 %v2178_v1, %v693_v10  ;;  %1096 = vrot.lane.b32.xlu0 %v1091_v11, %s2534_s15  ;;  %v1090_v21 = vsel %vm2784_vm6, %v502_v8, 0.0 }
 0x297   :  { %v713_v18 = vmax.f32 %v699_v9, 0.0 }
 0x298   :  { %v712_v15 = vmax.f32 %v694_v12, 0.0  ;;  %v2351_v16 = vpop.f32.mrb[8].mxu0 }
 0x299   :  { %v709_v19 = vadd.f32 %v2351_v16, %v2178_v1  ;;  %v703_v20 = vpop.f32.mrb[9].mxu0 }
 0x29a   :  { %v704_v23 = vadd.f32 %v2178_v1, %v703_v20  ;;  %2354 = vmatprep.mubr.msk.f32.mxu1 %vm52_vm0, %v712_v15  ;;  %1094 = vrot.lane.b32.xlu0 %v1090_v21, %s2534_s15  ;;  %v1080_v20 = vsel %vm2848_vm10, %v502_v8, 0.0  ;;  %v1302_v8 = vld [vmem:[%s3109_s6 + $0x8] sm:$0xff] }
 0x29b   :  { %2355 = vmatmul.mubr.msk.f32.vlgmr.msra.gmra.mrb[8].mxu1 %vm52_vm0, %v713_v18  ;;  %v715_v27 = vmax.f32 %v709_v19, 0.0 }
 0x29c   :  { %v714_v25 = vmax.f32 %v704_v23, 0.0  ;;  %v2364_v26 = vpop.f32.mrb[10].mxu0  ;;  %2448 = vmatpush3.bf16.msra.mxu1 %v2445_v58  ;;  %v312_v58 = vadd.f32 %v2745_v50, %v2743_v49  ;;  %v1301_v49 = vld [vmem:[%s3109_s6] sm:$0xff]  ;;  %s2537_s6 = smov 1  }
 0x29d   :  { %v920_v28 = vadd.f32 %v2364_v26, %v2189_v24  ;;  %v914_v29 = vpop.f32.mrb[11].mxu0  ;;  %2450 = vmatprep.subr.bf16.mxu1 %v2449_v22  ;;  %2384 = vmatprep.mubr.msk.f32.mxu0 %vm52_vm0, %v1301_v49  ;;  %v1384_v26 = vld [vmem:[%s3110_s7] sm:$0xff] }
 0x29e   :  { %2357 = vmatprep.mubr.msk.f32.mxu1 %vm52_vm0, %v714_v25  ;;  %v915_v30 = vadd.f32 %v2189_v24, %v914_v29  ;;  %v316_v12 = vmax.f32 %v312_v58, 0.0 }
 0x29f   :  { %2358 = vmatmul.mubr.msk.f32.gmra.mrb[10].mxu1 %vm52_vm0, %v715_v27  ;;  %v934_v31 = vmax.f32 %v920_v28, 0.0 }
 0x2a0   :  { %v933_v32 = vmax.f32 %v915_v30, 0.0  ;;  %v2367_v33 = vpop.f32.mrb[12].mxu0  ;;  %2452 = vmatpush3.bf16.msra.mxu1 %v2449_v22  ;;  %v1192_v51 = vsel %vm2767_vm5, %v316_v12, 0.0 }
 0x2a1   :  { %v930_v34 = vadd.f32 %v2367_v33, %v2189_v24  ;;  %v924_v35 = vpop.f32.mrb[13].mxu0 }
 0x2a2   :  { %v925_v36 = vadd.f32 %v2189_v24, %v924_v35  ;;  %2376 = vmatprep.mubr.msk.f32.mxu1 %vm420_vm4, %v933_v32 }
 0x2a3   :  { %v936_v37 = vmax.f32 %v930_v34, 0.0  ;;  %2377 = vmatmul.mubr.msk.f32.vlgmr.msra.gmra.mrb[12].mxu1 %vm420_vm4, %v934_v31 }
 0x2a4   :  { %v935_v38 = vmax.f32 %v925_v36, 0.0  ;;  %v315_v36 = vmax.f32 %v2750_v53, 0.0 }
 0x2a6   :  { %2379 = vmatprep.mubr.msk.f32.mxu1 %vm420_vm4, %v935_v38  ;;  %v1188_v38 = vsel %vm2804_vm7, %v316_v12, 0.0  ;;  %v1191_v43 = vsel %vm2784_vm6, %v315_v36, 0.0 }
 0x2a7   :  { %2380 = vmatmul.mubr.msk.f32.gmra.mrb[14].mxu1 %vm420_vm4, %v936_v37 }
 0x308   :  { %v1097_v40 = vpop.permute.xlu0 %1096 }
 0x309   :  { %v1101_v42 = vadd.f32 %v1097_v40, %v1081_v41 }
 0x30b   :  { %1103 = vrot.lane.b32.xlu1 %v1101_v42, %s2535_s20 }
 0x30c   :  { %v1095_v16 = vpop.permute.xlu0 %1094 }
 0x30d   :  { %v1100_v23 = vadd.f32 %v1095_v16, %v1080_v20 }
 0x36e   :  { %v2356_v45 = vpop.f32.mrb[8].mxu1 }
 0x36f   :  { %v800_v46 = vpop.f32.mrb[9].mxu1  ;;  %v806_v13 = vadd.f32 %v2356_v45, %v2184_v47  ;;  %v2538_v45 = vmov 0  }
 0x370   :  { %v2816_v55 = vadd.f32 %v2184_v47, %v800_v46  ;;  %2479 = vset.pattern.permute.xlu1 %v2538_v45  ;;  %2478 = vset.pattern.permute.xlu0 %v2538_v45  ;;  %v1486_v46 = vld [vmem:[%s3113_s10] sm:$0xff] }
 0x371   :  { %v820_v24 = vmax.f32 %v806_v13, 0.0 }
 0x372   :  { %v2359_v54 = vpop.f32.mrb[10].mxu1  ;;  %v819_v50 = vmax.f32 %v2816_v55, 0.0  ;;  %v1187_v55 = vsel %vm2848_vm10, %v315_v36, 0.0 }
 0x373   :  { %v816_v56 = vadd.f32 %v2359_v54, %v2184_v47  ;;  %v810_v57 = vpop.f32.mrb[11].mxu1  ;;  %v1218_v25 = vsel %vm2767_vm5, %v820_v24, 0.0  ;;  %v1210_v52 = vsel %vm2804_vm7, %v820_v24, 0.0 }
 0x374   :  { %v811_v59 = vadd.f32 %v2184_v47, %v810_v57  ;;  %v1217_v21 = vsel %vm2784_vm6, %v819_v50, 0.0  ;;  %v1209_v54 = vsel %vm2848_vm10, %v819_v50, 0.0 }
 0x375   :  { %v822_v61 = vmax.f32 %v816_v56, 0.0 }
 0x376   :  { %v821_v1 = vmax.f32 %v811_v59, 0.0  ;;  %v2378_v2 = vpop.f32.mrb[12].mxu1 }
 0x377   :  { %v1220_v9 = vsel %vm2820_vm8, %v822_v61, 0.0  ;;  %v2837_v10 = vadd.f32 %v2378_v2, %v2195_v3  ;;  %v1024_v11 = vpop.f32.mrb[13].mxu1  ;;  %v1212_v28 = vsel %vm2876_vm11, %v822_v61, 0.0 }
 0x378   :  { %1231 = vrot.lane.b32.xlu0 %v1220_v9, %s2536_s3  ;;  %v1219_v14 = vsel %vm2824_vm9, %v821_v1, 0.0  ;;  %v2843_v15 = vadd.f32 %v2195_v3, %v1024_v11  ;;  %v1211_v32 = vsel %vm2880_vm12, %v821_v1, 0.0 }
 0x379   :  { %1229 = vrot.lane.b32.xlu1 %v1219_v14, %s2536_s3 }
 0x37a   :  { %v2381_v19 = vpop.f32.mrb[14].mxu1 }
 0x37b   :  { %v1034_v22 = vpop.f32.mrb[15].mxu1  ;;  %v2888_v33 = vadd.f32 %v2381_v19, %v2195_v3 }
 0x37c   :  { %1225 = vrot.lane.b32.xlu0 %v1217_v21, %s2536_s3  ;;  %v2890_v34 = vadd.f32 %v2195_v3, %v1034_v22 }
 0x37d   :  { %v1104_v7 = vpop.permute.xlu1 %1103  ;;  %1197 = vrot.lane.b32.xlu1 %v1192_v51, %s2536_s3  ;;  %v1046_v37 = vmax.f32 %v2888_v33, 0.0  ;;  %v1587_v33 = vld [vmem:[%s3111_s8] sm:$0xff] }
 0x37e   :  { %v2865_v63 = vsel %vm140_vm2, %v1100_v23, %v1104_v7  ;;  %v1045_v41 = vmax.f32 %v2890_v34, 0.0 }
 0x37f   :  { %2382 = vmatprep.subr.mxu0 %v2865_v63  ;;  %v1156_v53 = vsel %vm2820_vm8, %v1046_v37, 0.0  ;;  %v1142_v17 = vsel %vm2876_vm11, %v1046_v37, 0.0 }
 0x380   :  { %2383 = vmatpush3.msra.mxu0 %v2865_v63  ;;  %v1155_v44 = vsel %vm2824_vm9, %v1045_v41, 0.0 }
 0x381   :  { %1227 = vrot.lane.b32.xlu1 %v1218_v25, %s2536_s3  ;;  %2385 = vmatmul.mubr.msk.f32.vlgmr.msra.gmra.mrb[14].mxu0 %vm52_vm0, %v1302_v8 }
 0x382   :  { %2396 = vmatprep.mubr.msk.f32.mxu0 %vm52_vm0, %v1486_v46 }
 0x3ea   :  { %v1232_v29 = vpop.permute.xlu0 %1231 }
 0x3eb   :  { %v1240_v30 = vadd.f32 %v1232_v29, %v1212_v28  ;;  %v1230_v31 = vpop.permute.xlu1 %1229 }
 0x3ec   :  { %v1239_v35 = vadd.f32 %v1230_v31, %v1211_v32 }
 0x3ed   :  { %1245 = vrot.lane.b32.xlu1 %v1240_v30, %s2537_s6 }
 0x3ee   :  { %1243 = vrot.lane.b32.xlu0 %v1239_v35, %s2537_s6  ;;  %v1226_v48 = vpop.permute.xlu0 %1225 }
 0x3ef   :  { %v1198_v40 = vpop.permute.xlu1 %1197  ;;  %v1237_v57 = vadd.f32 %v1226_v48, %v1209_v54 }
 0x3f0   :  { %v1202_v42 = vadd.f32 %v1198_v40, %v1188_v38 }
 0x3f2   :  { %1204 = vrot.lane.b32.xlu1 %v1202_v42, %s2537_s6  ;;  %1195 = vrot.lane.b32.xlu0 %v1191_v43, %s2536_s3 }
 0x3f3   :  { %v1228_v47 = vpop.permute.xlu1 %1227 }
 0x3f4   :  { %v1238_v56 = vadd.f32 %v1228_v47, %v1210_v52 }
 0x3f6   :  { %1167 = vrot.lane.b32.xlu1 %v1156_v53, %s2534_s15  ;;  %1165 = vrot.lane.b32.xlu0 %v1155_v44, %s2534_s15 }
 0x45f   :  { %v1246_v58 = vpop.permute.xlu1 %1245 }
 0x460   :  { %v1250_v59 = vsel %vm1207_vm13, %v1238_v56, %v1246_v58  ;;  %v1244_v60 = vpop.permute.xlu0 %1243 }
 0x461   :  { %v1273_v61 = vmul.f32 0.5, %v1250_v59  ;;  %v1249_v62 = vsel %vm1207_vm13, %v1237_v57, %v1244_v60 }
 0x462   :  { %v1272_v1 = vmul.f32 0.5, %v1249_v62 }
 0x463   :  { %v1275_v2 = vsel %vm1252_vm14, %v1273_v61, -inf }
 0x464   :  { %v1274_v3 = vsel %vm1252_vm14, %v1272_v1, -inf  ;;  %v1196_v49 = vpop.permute.xlu0 %1195  ;;  %v1205_v11 = vpop.permute.xlu1 %1204 }
 0x465   :  { %v1276_v50 = vmax.f32 %v1274_v3, %v1275_v2  ;;  %v1201_v9 = vadd.f32 %v1196_v49, %v1187_v55 }
 0x467   :  { %v1277_v12 = vrot.slane %v1276_v50, 4  ;;  %v1208_v13 = vsel %vm1207_vm13, %v1201_v9, %v1205_v11  ;;  %v1487_v9 = vld [vmem:[%s3113_s10 + $0x8] sm:$0xff]  ;;  %v1488_v11 = vld [vmem:[%s3113_s10 + $0x10] sm:$0xff] }
 0x468   :  { %v1251_v14 = vmul.f32 0.5, %v1208_v13  ;;  %v1166_v13 = vpop.permute.xlu0 %1165  ;;  %v1168_v27 = vpop.permute.xlu1 %1167 }
 0x469   :  { %v1278_v16 = vmax.f32 %v1276_v50, %v1277_v12  ;;  %v1043_v12 = vmax.f32 %v2843_v15, 0.0 }
 0x46a   :  { %v1253_v19 = vsel %vm1252_vm14, %v1251_v14, -inf }
 0x46b   :  { %v1279_v20 = vrot.slane %v1278_v16, 2  ;;  %v1254_v21 = vrot.slane %v1253_v19, 4  ;;  %v1139_v37 = vsel %vm2848_vm10, %v1043_v12, 0.0 }
 0x46d   :  { %v1280_v22 = vmax.f32 %v1278_v16, %v1279_v20  ;;  %v1255_v23 = vmax.f32 %v1253_v19, %v1254_v21  ;;  %v1489_v16 = vld [vmem:[%s3113_s10 + $0x18] sm:$0xff]  ;;  %v2386_v19 = vpop.f32.mrb[14].mxu0  ;;  %v1141_v21 = vsel %vm2880_vm12, %v1045_v41, 0.0  ;;  %v2542_v41 = vmov 0.0  }
 0x46e   :  { %v1375_v20 = vpop.f32.mrb[15].mxu0  ;;  %v1175_v15 = vadd.f32 %v1166_v13, %v1141_v21  ;;  %2391 = vmatprep.mubr.msk.f32.mxu1 %vm2541_vm15, %v2542_v41 }
 0x46f   :  { %v1281_v24 = vrot.slane %v1280_v22, 1  ;;  %v1256_v51 = vrot.slane %v1255_v23, 2 }
 0x471   :  { %v1282_v7 = vmax.f32 %v1280_v22, %v1281_v24  ;;  %v1257_v8 = vmax.f32 %v1255_v23, %v1256_v51  ;;  %v1044_v22 = vmax.f32 %v2837_v10, 0.0  ;;  %v1153_v23 = vsel %vm2784_vm6, %v1043_v12, 0.0 }
 0x472   :  { %v2540_v24 = vmov 0.0|0.0   ;;  %v1176_v10 = vadd.f32 %v1168_v27, %v1142_v17 }
 0x473   :  { %v1283_v25 = vsub.f32 %v1272_v1, %v1282_v7  ;;  %v1284_v28 = vsub.f32 %v1273_v61, %v1282_v7  ;;  %v1258_v29 = vrot.slane %v1257_v8, 1  ;;  %2453 = vmatprep.subr.bf16.mxu1 %v2540_v24  ;;  %v1154_v34 = vsel %vm2767_vm5, %v1044_v22, 0.0  ;;  %v1689_v24 = vld [vmem:[%s3112_s9 + $0x8] sm:$0xff] }
 0x475   :  { %v1285_v30 = vmul.f32 1.442695, %v1283_v25  ;;  %v1287_v31 = vmul.f32 1.442695, %v1284_v28  ;;  %v1259_v32 = vmax.f32 %v1257_v8, %v1258_v29 }
 0x477   :  { %2488 = vpow2.f32 %v1285_v30  ;;  %v1260_v35 = vsub.f32 %v1251_v14, %v1259_v32  ;;  %v2539_v14 = vmov 1  }
 0x478   :  { %2490 = vpow2.f32 %v1287_v31 }
 0x479   :  { %v1261_v36 = vmul.f32 1.442695, %v1260_v35 }
 0x47b   :  { %2492 = vpow2.f32 %v1261_v36 }
 0x481   :  { %v2489_v38 = vpop.eup %2488 }
 0x482   :  { %v2491_v40 = vpop.eup %2490  ;;  %v1289_v42 = vsel %vm1252_vm14, %v2489_v38, 0.0 }
 0x483   :  { %v1290_v43 = vsel %vm1252_vm14, %v2491_v40, 0.0 }
 0x484   :  { %v1291_v53 = vadd.f32 %v1290_v43, %v1289_v42 }
 0x485   :  { %v2493_v44 = vpop.eup %2492 }
 0x486   :  { %v1292_v46 = vrot.slane %v1291_v53, 4  ;;  %v1263_v47 = vsel %vm1252_vm14, %v2493_v44, 0.0 }
 0x487   :  { %v1264_v48 = vrot.slane %v1263_v47, 4 }
 0x488   :  { %v1293_v52 = vadd.f32 %v1292_v46, %v1291_v53  ;;  %v1589_v46 = vld [vmem:[%s3111_s8 + $0x10] sm:$0xff] }
 0x489   :  { %v1265_v54 = vadd.f32 %v1264_v48, %v1263_v47  ;;  %v1590_v47 = vld [vmem:[%s3111_s8 + $0x18] sm:$0xff] }
 0x48a   :  { %v1294_v56 = vrot.slane %v1293_v52, 2 }
 0x48b   :  { %v1266_v57 = vrot.slane %v1265_v54, 2 }
 0x48c   :  { %v1295_v58 = vadd.f32 %v1294_v56, %v1293_v52 }
 0x48d   :  { %v1267_v59 = vadd.f32 %v1266_v57, %v1265_v54  ;;  %v1688_v57 = vld [vmem:[%s3112_s9] sm:$0xff] }
 0x48e   :  { %v1296_v60 = vrot.slane %v1295_v58, 1 }
 0x48f   :  { %v1268_v61 = vrot.slane %v1267_v59, 1 }
 0x490   :  { %v1297_v62 = vadd.f32 %v1296_v60, %v1295_v58 }
 0x491   :  { %v1269_v1 = vadd.f32 %v1268_v61, %v1267_v59 }
 0x492   :  { %2494 = vrcp.f32 %v1297_v62 }
 0x493   :  { %2496 = vrcp.f32 %v1269_v1 }
 0x49c   :  { %v2495_v2 = vpop.eup %2494 }
 0x49d   :  { %v2497_v3 = vpop.eup %2496  ;;  %v1300_v49 = vmul.f32 %v2495_v2, %v2491_v40  ;;  %v1299_v55 = vmul.f32 %v2495_v2, %v2489_v38  ;;  %v1140_v38 = vsel %vm2804_vm7, %v1044_v22, 0.0 }
 0x49e   :  { %v1271_v50 = vmul.f32 %v2497_v3, %v2493_v44 }
 0x49f   :  { %1392 = vperm.xlu1 %2479, %v1300_v49   ;;  %1387 = vperm.xlu0 %2478, %v1299_v55  }
 0x4a0   :  { %2394 = vmatprep.subr.mxu0 %v1271_v50 }
 0x4a1   :  { %2395 = vmatpush3.msra.mxu0 %v1271_v50 }
 0x4a2   :  { %2397 = vmatmul.mubr.msk.f32.vlgmr.msra.gmra.mrb[16].mxu0 %vm52_vm0, %v1487_v9 }
 0x4a3   :  { %2480 = vset.pattern.permute.xlu1 %v2539_v14  ;;  %2481 = vset.pattern.permute.xlu0 %v2539_v14 }
 0x4a4   :  { %1396 = vperm.xlu1 %2480, %v1299_v55   ;;  %1400 = vperm.xlu0 %2481, %v1300_v49  }
 0x4a5   :  { %2399 = vmatprep.mubr.msk.f32.mxu0 %vm52_vm0, %v1488_v11 }
 0x4a6   :  { %2400 = vmatmul.mubr.msk.f32.gmra.mrb[18].mxu0 %vm52_vm0, %v1489_v16 }
 0x4a7   :  { %2420 = vmatprep.mubr.msk.f32.mxu0 %vm420_vm4, %v1688_v57  ;;  %v2213_v57 = vld [vmem:[%s3115_s12 + $0xa] ss:$0 sm:$0xff] }
 0x4a8   :  { %1161 = vrot.lane.b32.xlu1 %v1153_v23, %s2534_s15  ;;  %1179 = vrot.lane.b32.xlu0 %v1175_v15, %s2535_s20 }
 0x4a9   :  { %2483 = vset.pattern.permute.xlu1 %v2538_v45  ;;  %2482 = vset.pattern.permute.xlu0 %v2538_v45 }
 0x4ac   :  { %1163 = vrot.lane.b32.xlu1 %v1154_v34, %s2534_s15 }
 0x4b0   :  { %1181 = vrot.lane.b32.xlu1 %v1176_v10, %s2535_s20 }
 0x51e   :  { %v1393_v51 = vpop.permute.xlu1 %1392  ;;  %v1388_v7 = vpop.permute.xlu0 %1387 }
 0x523   :  { %v1397_v8 = vpop.permute.xlu1 %1396  ;;  %v1401_v25 = vpop.permute.xlu0 %1400 }
 0x524   :  { %v1404_v4 = vsel %vm140_vm2, %v1393_v51, %v1401_v25  ;;  %v1403_v28 = vsel %vm140_vm2, %v1388_v7, %v1397_v8 }
 0x525   :  { %v1406_v29 = vmul.f32 %v2386_v19, %v1404_v4  ;;  %v1405_v30 = vmul.f32 %v1403_v28, %v1375_v20 }
 0x527   :  { %v2454_v31 = vpack.c.bf16 %v1406_v29, %v1405_v30  ;;  %v1162_v32 = vpop.permute.xlu1 %1161  ;;  %v1180_v42 = vpop.permute.xlu0 %1179 }
 0x528   :  { %v1173_v36 = vadd.f32 %v1162_v32, %v1139_v37 }
 0x529   :  { %2455 = vmatpush3.bf16.msra.mxu1 %v2454_v31 }
 0x52a   :  { %v2983_v53 = vsel %vm140_vm2, %v1173_v36, %v1180_v42 }
 0x52b   :  { %v1164_v35 = vpop.permute.xlu1 %1163 }
 0x52c   :  { %2392 = vmatmul.mubr.msk.f32.vlgmr.msra.gmra.mrb[16].mxu1 %vm508_vm3, %v1384_v26  ;;  %v1174_v40 = vadd.f32 %v1164_v35, %v1140_v38 }
 0x52d   :  { %2406 = vmatprep.mubr.msk.f32.mxu1 %vm508_vm3, %v1587_v33 }
 0x52f   :  { %v1182_v43 = vpop.permute.xlu1 %1181 }
 0x530   :  { %v2986_v44 = vsel %vm140_vm2, %v1174_v40, %v1182_v43 }
 0x531   :  { %v2456_v18 = vpack.c.bf16 %v2986_v44, %v2983_v53 }
 0x533   :  { %2457 = vmatprep.subr.bf16.mxu1 %v2456_v18 }
 0x534   :  { %2459 = vmatpush3.bf16.msra.mxu1 %v2456_v18 }
 0x535   :  { %2423 = vmatprep.subr.mxu1 %v2542_v41 }
 0x537   :  { %2407 = vmatmul.mubr.msk.f32.vlgmr.msra.gmra.mrb[18].mxu1 %vm508_vm3, %v1588_v39 }
 0x538   :  { %2409 = vmatprep.mubr.msk.f32.mxu1 %vm508_vm3, %v1589_v46 }
 0x53b   :  { %2410 = vmatmul.mubr.msk.f32.gmra.mrb[20].mxu1 %vm508_vm3, %v1590_v47  ;;  %v2006_v47 = vld [vmem:[%s3114_s11 + $0x78] sm:$0xf] }
 0x53c   :  { %2425 = vmatprep.mubr.msk.f32.mxu1 %vm2541_vm15, %v2542_v41 }
 0x575   :  { %v2398_v48 = vpop.f32.mrb[16].mxu0 }
 0x576   :  { %1697 = vperm.xlu1 %2483, %v2398_v48   ;;  %v1568_v52 = vpop.f32.mrb[17].mxu0 }
 0x577   :  { %1692 = vperm.xlu0 %2482, %v1568_v52  }
 0x579   :  { %v2401_v54 = vpop.f32.mrb[18].mxu0 }
 0x57a   :  { %2484 = vset.pattern.permute.xlu1 %v2539_v14  ;;  %v1578_v56 = vpop.f32.mrb[19].mxu0 }
 0x57b   :  { %1711 = vperm.xlu1 %2484, %v1568_v52   ;;  %2485 = vset.pattern.permute.xlu0 %v2539_v14 }
 0x57c   :  { %1715 = vperm.xlu0 %2485, %v2398_v48  }
 0x57f   :  { %2486 = vset.pattern.permute.xlu1 %v2538_v45 }
 0x580   :  { %1702 = vperm.xlu1 %2486, %v1578_v56   ;;  %1719 = vperm.xlu0 %2485, %v1578_v56  }
 0x584   :  { %1707 = vperm.xlu1 %2486, %v2401_v54  }
 0x588   :  { %2487 = vset.pattern.permute.xlu1 %v2539_v14 }
 0x589   :  { %1723 = vperm.xlu1 %2487, %v2401_v54  }
 0x5f5   :  { %v1698_v58 = vpop.permute.xlu1 %1697 }
 0x5f6   :  { %v1693_v45 = vpop.permute.xlu0 %1692 }
 0x5fa   :  { %v1712_v59 = vpop.permute.xlu1 %1711 }
 0x5fb   :  { %v1716_v3 = vpop.permute.xlu0 %1715  ;;  %v1726_v12 = vsel %vm140_vm2, %v1693_v45, %v1712_v59  ;;  %v2214_v59 = vld [vmem:[%s3115_s12 + $0xb] ss:$0 sm:$0xff] }
 0x5fc   :  { %v1727_v55 = vsel %vm140_vm2, %v1698_v58, %v1716_v3 }
 0x5ff   :  { %v1476_v60 = vpop.f32.mrb[16].mxu1  ;;  %v1703_v61 = vpop.permute.xlu1 %1702 }
 0x600   :  { %v1480_v62 = vmul.f32 %v1476_v60, %v2865_v63  ;;  %v2393_v1 = vpop.f32.mrb[17].mxu1  ;;  %v1720_v13 = vpop.permute.xlu0 %1719 }
 0x601   :  { %v1728_v15 = vsel %vm140_vm2, %v1703_v61, %v1720_v13 }
 0x602   :  { %1482 = vrot.lane.b32.xlu1 %v1480_v62, %s2534_s15 }
 0x603   :  { %v1708_v2 = vpop.permute.xlu1 %1707 }
 0x608   :  { %v1724_v50 = vpop.permute.xlu1 %1723 }
 0x609   :  { %v1729_v63 = vsel %vm140_vm2, %v1708_v2, %v1724_v50  ;;  %v2220_v50 = vld [vmem:[%s3115_s12 + $0xe] ss:$0 sm:$0xff] }
 0x60a   :  { %v2408_v49 = vpop.f32.mrb[18].mxu1 }
 0x60b   :  { %v1731_v9 = vmul.f32 %v2408_v49, %v1727_v55  ;;  %v1669_v11 = vpop.f32.mrb[19].mxu1 }
 0x60c   :  { %v1730_v14 = vmul.f32 %v1726_v12, %v1669_v11  ;;  %v2221_v11 = vld [vmem:[%s3115_s12 + $0xf] ss:$0 sm:$0xff] }
 0x60e   :  { %v2460_v16 = vpack.c.bf16 %v1731_v9, %v1730_v14  ;;  %v2411_v19 = vpop.f32.mrb[20].mxu1 }
 0x60f   :  { %v1733_v20 = vmul.f32 %v2411_v19, %v1729_v63  ;;  %v1679_v21 = vpop.f32.mrb[21].mxu1 }
 0x610   :  { %v1732_v22 = vmul.f32 %v1728_v15, %v1679_v21  ;;  %2461 = vmatprep.subr.bf16.mxu0 %v2460_v16 }
 0x611   :  { %2463 = vmatpush3.bf16.msra.mxu0 %v2460_v16 }
 0x612   :  { %v2464_v23 = vpack.c.bf16 %v1733_v20, %v1732_v22  ;;  %v2215_v20 = vld [vmem:[%s3115_s12 + $0x8] ss:$0 sm:$0xff] }
 0x614   :  { %2465 = vmatprep.subr.bf16.mxu0 %v2464_v23 }
 0x615   :  { %2467 = vmatpush3.bf16.msra.mxu0 %v2464_v23 }
 0x616   :  { %2428 = vmatprep.subr.msk.mxu0 %vm147_vm1, %v2006_v47 }
 0x618   :  { %2421 = vmatmul.mubr.msk.f32.vlgmr.msra.gmra.mrb[20].mxu0 %vm420_vm4, %v1689_v24 }
 0x619   :  { %2429 = vmatpush3.msk.msra.mxu0 %vm147_vm1, %v2006_v47 }
 0x674   :  { %v1483_v10 = vpop.permute.xlu1 %1482 }
 0x675   :  { %v1485_v51 = vadd.f32 %v1483_v10, %v1480_v62 }
 0x677   :  { %v1827_v7 = vadd.f32 %v1485_v51, %v2622_v0 }
 0x679   :  { %v1828_v8 = vsel %vm140_vm2, %v1827_v7, 0.0 }
 0x6eb   :  { %v2422_v27 = vpop.f32.mrb[20].mxu0 }
 0x6ec   :  { %v1806_v34 = vpop.f32.mrb[21].mxu0  ;;  %v1816_v17 = vmul.f32 %v2422_v27, %v2986_v44  ;;  %v2222_v27 = vld [vmem:[%s3115_s12 + $0x9] ss:$0 sm:$0xff] }
 0x6ed   :  { %v1815_v41 = vmul.f32 %v1806_v34, %v2983_v53 }
 0x6ef   :  { %1819 = vrot.lane.b32.xlu0 %v1815_v41, %s2534_s15 }
 0x6f3   :  { %1821 = vrot.lane.b32.xlu0 %v1816_v17, %s2534_s15 }
 0x712   :  { %1829 = vadd.xlane.f32.xlu0 %v1828_v8 }
 0x761   :  { %v1820_v25 = vpop.permute.xlu0 %1819 }
 0x762   :  { %v1825_v4 = vadd.f32 %v1820_v25, %v1815_v41 }
 0x764   :  { %v1964_v28 = vadd.f32 %v1825_v4, %v2646_v5  ;;  %v1854_v5 = vld [vmem:[%s3114_s11 + $0x70] sm:$0xf] }
 0x765   :  { %v1822_v29 = vpop.permute.xlu0 %1821  ;;  %2424 = vmatpush3.msk.msra.mxu1 %vm147_vm1, %v1854_v5 }
 0x766   :  { %v1826_v30 = vadd.f32 %v1822_v29, %v1816_v17  ;;  %v1966_v31 = vsel %vm140_vm2, %v1964_v28, 0.0 }
 0x767   :  { %1967 = vadd.xlane.f32.xlu1 %v1966_v31 }
 0x768   :  { %v1965_v32 = vadd.f32 %v1826_v30, %v2651_v6 }
 0x76a   :  { %v1969_v26 = vsel %vm140_vm2, %v1965_v32, 0.0 }
 0x76b   :  { %1970 = vadd.xlane.f32.xlu0 %v1969_v26 }
 0x79f   :  { %v1830_v33 = vpop.xlane.xlu0 %1829 }
 0x7a0   :  { %v1832_v37 = vmul.f32 0.25, %v1830_v33 }
 0x7a2   :  { %v1833_v0 = vsub.f32 %v1827_v7, %v1832_v37 }
 0x7a4   :  { %v1834_v35 = vmul.f32 %v1833_v0, %v1833_v0 }
 0x7a6   :  { %v1835_v36 = vsel %vm140_vm2, %v1834_v35, 0.0 }
 0x7a7   :  { %1836 = vadd.xlane.f32.xlu0 %v1835_v36 }
 0x7f4   :  { %v1968_v38 = vpop.xlane.xlu1 %1967 }
 0x7f5   :  { %v1972_v40 = vmul.f32 0.25, %v1968_v38 }
 0x7f7   :  { %v1974_v42 = vsub.f32 %v1964_v28, %v1972_v40 }
 0x7f8   :  { %v1971_v6 = vpop.xlane.xlu0 %1970 }
 0x7f9   :  { %v1973_v43 = vmul.f32 0.25, %v1971_v6  ;;  %v1976_v53 = vmul.f32 %v1974_v42, %v1974_v42 }
 0x7fb   :  { %v1975_v44 = vsub.f32 %v1965_v32, %v1973_v43  ;;  %v1978_v18 = vsel %vm140_vm2, %v1976_v53, 0.0 }
 0x7fc   :  { %1979 = vadd.xlane.f32.xlu1 %v1978_v18 }
 0x7fd   :  { %v1977_v39 = vmul.f32 %v1975_v44, %v1975_v44 }
 0x7ff   :  { %v1981_v46 = vsel %vm140_vm2, %v1977_v39, 0.0  ;;  %v2219_v39 = vld [vmem:[%s3115_s12 + $0xd] ss:$0 sm:$0xff] }
 0x800   :  { %1982 = vadd.xlane.f32.xlu1 %v1981_v46 }
 0x834   :  { %v1837_v48 = vpop.xlane.xlu0 %1836 }
 0x835   :  { %v1838_v52 = vmul.f32 0.25, %v1837_v48 }
 0x837   :  { %v1839_v54 = vadd.f32 1e-05, %v1838_v52 }
 0x839   :  { %2498 = vrsqrt.f32 %v1839_v54 }
 0x843   :  { %v2499_v56 = vpop.eup %2498 }
 0x844   :  { %v1841_v58 = vmul.f32 %v2499_v56, %v1833_v0 }
 0x846   :  { %v1847_v60 = vmul.f32 %v2213_v57, %v1841_v58 }
 0x848   :  { %v1853_v61 = vadd.f32 %v2214_v59, %v1847_v60 }
 0x84a   :  { %2426 = vmatmul.mubr.msk.f32.vlgmr.msra.gmra.mrb[22].mxu1 %vm140_vm2, %v1853_v61 }
 0x889   :  { %v1980_v62 = vpop.xlane.xlu1 %1979 }
 0x88a   :  { %v1984_v1 = vmul.f32 0.25, %v1980_v62 }
 0x88c   :  { %v1986_v45 = vadd.f32 1e-05, %v1984_v1 }
 0x88d   :  { %v1983_v2 = vpop.xlane.xlu1 %1982 }
 0x88e   :  { %2500 = vrsqrt.f32 %v1986_v45  ;;  %v1985_v3 = vmul.f32 0.25, %v1983_v2 }
 0x890   :  { %v1987_v49 = vadd.f32 1e-05, %v1985_v3 }
 0x892   :  { %2502 = vrsqrt.f32 %v1987_v49 }
 0x898   :  { %v2501_v55 = vpop.eup %2500 }
 0x899   :  { %v1990_v9 = vmul.f32 %v2501_v55, %v1974_v42 }
 0x89b   :  { %v1997_v12 = vmul.f32 %v2220_v50, %v1990_v9 }
 0x89c   :  { %v2503_v13 = vpop.eup %2502 }
 0x89d   :  { %v1991_v14 = vmul.f32 %v2503_v13, %v1975_v44  ;;  %v2004_v16 = vadd.f32 %v2221_v11, %v1997_v12  ;;  %v2218_v44 = vld [vmem:[%s3115_s12 + $0xc] ss:$0 sm:$0xff] }
 0x89f   :  { %v1998_v19 = vmul.f32 %v2220_v50, %v1991_v14  ;;  %2430 = vmatprep.mubr.msk.f32.mxu0 %vm140_vm2, %v2004_v16 }
 0x8a1   :  { %v2005_v63 = vadd.f32 %v2221_v11, %v1998_v19 }
 0x8a3   :  { %2431 = vmatmul.mubr.msk.f32.vlgmr.msra.gmra.mrb[22].mxu0 %vm140_vm2, %v2005_v63 }
 0x91d   :  { %v1932_v21 = vpop.f32.mrb[22].mxu1 }
 0x91e   :  { %v1933_v15 = vadd.f32 %v2215_v20, %v1932_v21  ;;  %v2427_v22 = vpop.f32.mrb[23].mxu1 }
 0x920   :  { %v1936_v23 = vmax.f32 %v1933_v15, 0.0 }
 0x922   :  { %v1937_v24 = vsel %vm52_vm0, %v1936_v23, 0.0 }
 0x923   :  { %1938 = vadd.xlane.f32.xlu0 %v1937_v24 }
 0x976   :  { %v2432_v34 = vpop.f32.mrb[22].mxu0 }
 0x977   :  { %v2093_v41 = vadd.f32 %v2432_v34, %v2222_v27  ;;  %v2087_v17 = vpop.f32.mrb[23].mxu0 }
 0x978   :  { %v2088_v10 = vadd.f32 %v2222_v27, %v2087_v17 }
 0x979   :  { %v2097_v51 = vmax.f32 %v2093_v41, 0.0 }
 0x97a   :  { %v2096_v7 = vmax.f32 %v2088_v10, 0.0 }
 0x97b   :  { %v2101_v8 = vsel %vm52_vm0, %v2097_v51, 0.0 }
 0x97c   :  { %2102 = vadd.xlane.f32.xlu0 %v2101_v8  ;;  %v2098_v25 = vsel %vm52_vm0, %v2096_v7, 0.0 }
 0x97d   :  { %2099 = vadd.xlane.f32.xlu1 %v2098_v25 }
 0x9b0   :  { %v1939_v4 = vpop.xlane.xlu0 %1938 }
 0x9b1   :  { %v1941_v28 = vmul.f32 0.125, %v1939_v4 }
 0x9b3   :  { %v1942_v29 = vsub.f32 %v1936_v23, %v1941_v28 }
 0x9b5   :  { %v1943_v30 = vmul.f32 %v1942_v29, %v1942_v29 }
 0x9b7   :  { %v1944_v31 = vsel %vm52_vm0, %v1943_v30, 0.0 }
 0x9b8   :  { %1945 = vadd.xlane.f32.xlu1 %v1944_v31 }
 0xa09   :  { %v2103_v32 = vpop.xlane.xlu0 %2102 }
 0xa0a   :  { %v2105_v26 = vmul.f32 0.125, %v2103_v32  ;;  %v2100_v33 = vpop.xlane.xlu1 %2099 }
 0xa0b   :  { %v2104_v37 = vmul.f32 0.125, %v2100_v33 }
 0xa0c   :  { %v2107_v0 = vsub.f32 %v2097_v51, %v2105_v26 }
 0xa0d   :  { %v2106_v35 = vsub.f32 %v2096_v7, %v2104_v37 }
 0xa0e   :  { %v2109_v36 = vmul.f32 %v2107_v0, %v2107_v0 }
 0xa0f   :  { %v2108_v5 = vmul.f32 %v2106_v35, %v2106_v35 }
 0xa10   :  { %v2113_v38 = vsel %vm52_vm0, %v2109_v36, 0.0 }
 0xa11   :  { %2114 = vadd.xlane.f32.xlu1 %v2113_v38  ;;  %v2110_v40 = vsel %vm52_vm0, %v2108_v5, 0.0 }
 0xa12   :  { %2111 = vadd.xlane.f32.xlu0 %v2110_v40 }
 0xa45   :  { %v1946_v42 = vpop.xlane.xlu1 %1945 }
 0xa46   :  { %v1947_v6 = vmul.f32 0.125, %v1946_v42 }
 0xa48   :  { %v1948_v43 = vadd.f32 1e-05, %v1947_v6 }
 0xa4a   :  { %2504 = vrsqrt.f32 %v1948_v43 }
 0xa54   :  { %v2505_v53 = vpop.eup %2504 }
 0xa55   :  { %v1950_v18 = vmul.f32 %v2505_v53, %v1942_v29 }
 0xa57   :  { %v1956_v46 = vmul.f32 %v2218_v44, %v1950_v18 }
 0xa59   :  { %v1962_v47 = vadd.f32 %v2219_v39, %v1956_v46 }
 0xa5b   :  { %1963 = vst.msk [vmem:[#allocation2] sm:$0xff] %vm52_vm0, %v1962_v47 }
 0xa5c   :  { %2521 = shalt.err (!%p2518_p4)
}
 0xa5d   :  { %s2522_s5 = scalar_lea.hbm %s3116_s13, 128 }
 0xa5e   :  { %p2523_p5 = scmp.ne.s32.totalorder %s3116_s13, %s2522_s5  ;;  %p2526_p6 = scmp.lt.u32.totalorder %s2522_s5, %s3116_s13 }
 0xa60   :  { %p2528_p7 = pnand %p2526_p6, %p2523_p5 }
 0xa62   :  { %2531 = shalt.err (!%p2528_p7)
}
 0xa63   :  { %2149 = dma.vmem_to_hbm [thread:$0]  %s2147_s21, 128, %s3116_s13, [#allocation3]   ;;  %v2226_v60 = vld [vmem:[%s3115_s12 + $0x10] ss:$0 sm:$0xff]  ;;  %v2227_v1 = vld [vmem:[%s3115_s12 + $0x11] ss:$0 sm:$0xff] }
 0xa9e   :  { %v2115_v48 = vpop.xlane.xlu1 %2114 }
 0xa9f   :  { %v2117_v52 = vmul.f32 0.125, %v2115_v48  ;;  %v2112_v54 = vpop.xlane.xlu0 %2111 }
 0xaa0   :  { %v2116_v56 = vmul.f32 0.125, %v2112_v54 }
 0xaa1   :  { %v2119_v57 = vadd.f32 1e-05, %v2117_v52 }
 0xaa2   :  { %v2118_v58 = vadd.f32 1e-05, %v2116_v56 }
 0xaa3   :  { %2506 = vrsqrt.f32 %v2119_v57 }
 0xaa4   :  { %2508 = vrsqrt.f32 %v2118_v58 }
 0xaad   :  { %v2507_v59 = vpop.eup %2506 }
 0xaae   :  { %v2509_v61 = vpop.eup %2508  ;;  %v2123_v62 = vmul.f32 %v2507_v59, %v2107_v0 }
 0xaaf   :  { %v2122_v45 = vmul.f32 %v2509_v61, %v2106_v35 }
 0xab0   :  { %v2130_v2 = vmul.f32 %v2226_v60, %v2123_v62 }
 0xab1   :  { %v2129_v3 = vmul.f32 %v2226_v60, %v2122_v45 }
 0xab2   :  { %v2137_v49 = vadd.f32 %v2227_v1, %v2130_v2 }
 0xab3   :  { %v2136_v55 = vadd.f32 %v2227_v1, %v2129_v3 }
 0xab4   :  { %2139 = vst.msk [vmem:[%s3117_s14 + $0x8] sm:$0xff] %vm52_vm0, %v2137_v49 }
 0xab5   :  { %2138 = vst.msk [vmem:[%s3117_s14] sm:$0xff] %vm52_vm0, %v2136_v55 }
 0xab6   :  { %2532 = dma.done.wait [#allocation3], 128  }
 0xab7   :  { %2533 = vsyncadd [#allocation3], 4294967168 }
 0xab8   :  { %2157 = vsyncpa [#allocation3], 1 }

</bundles_post_ra>
